<compile_context>
chip_gen: v7x
topology: tpu7x:2x2x1
jax: 0.10.0
libtpu: 0.0.40
codegen_flags: <defaults>
</compile_context>

<pallas_src>
import jax
import jax.numpy as jnp
from jax.experimental import pallas as pl
from jax.experimental.pallas import tpu as pltpu

# ------------------------- configuration (cfg.*) ----------------------------
ANCHOR_SCALES = (8.0, 16.0, 32.0)
ANCHOR_RATIOS = (0.5, 1.0, 2.0)
FEAT_STRIDE = 16
NUM_ANCHORS = len(ANCHOR_SCALES) * len(ANCHOR_RATIOS)          # A = 9
NC_SCORE_OUT = NUM_ANCHORS * 2                                 # 18
NC_BBOX_OUT = NUM_ANCHORS * 4                                  # 36
RPN_MID = 512                                                  # hidden conv channels
POST_NMS_TOP_N = 64                                            # proposals kept
HEAD_SLAB = 128                                                # lane-dense head output


# ------------------------------ Pallas kernel --------------------------------
def fused_rpn_kernel(x_tile_ref, x_hbm, wc_ref, bc_ref, wh_ref, bh_ref, o_ref,
                     halo_ref, dma_sem):
    """One (batch, row-tile) grid step: 3x3 conv + ReLU + merged heads + softmax.

    x_tile_ref: (1, TH, W, Cin) f32   auto-pipelined interior rows of this tile
    x_hbm     : (B, H, W, Cin)  f32   raw HBM ref (used only for the halo rows)
    wc_ref    : (3, 3*Cin, 512) bf16  conv weight, one K=3*Cin matrix per dy
    bc_ref    : (1, 512)        f32   conv bias
    wh_ref    : (512, 128)      bf16  merged head weight
                                      cols 0:A   = w_bg - w_fg  (sigmoid -> bg prob)
                                      cols A:2A  = w_fg - w_bg  (sigmoid -> fg prob)
                                      cols 2A:6A = bbox weight, cols 6A:128 = 0
    bh_ref    : (1, 128)        f32   merged head bias (same column layout)
    o_ref     : (1, TH, W, 128) bf16  [bg_prob | fg_prob | bbox_pred | pad]
    halo_ref  : (2, W, Cin)     f32   scratch: row above / row below the tile
    dma_sem   : DMA semaphores  (2,)
    """
    b = pl.program_id(0)
    r = pl.program_id(1)
    n_r = pl.num_programs(1)
    TH = x_tile_ref.shape[1]
    W = x_tile_ref.shape[2]
    Cin = x_tile_ref.shape[3]
    A = NUM_ANCHORS

    # --- halo rows: fetched straight from HBM; the conv's zero padding is
    #     produced here instead of a wrapper-side jnp.pad over the whole map.
    @pl.when(r > 0)
    def _():
        cp = pltpu.make_async_copy(x_hbm.at[b, r * TH - 1], halo_ref.at[0],
                                   dma_sem.at[0])
        cp.start()
        cp.wait()

    @pl.when(r == 0)
    def _():
        halo_ref[0] = jnp.zeros((W, Cin), jnp.float32)

    @pl.when(r < n_r - 1)
    def _():
        cp = pltpu.make_async_copy(x_hbm.at[b, (r + 1) * TH], halo_ref.at[1],
                                   dma_sem.at[1])
        cp.start()
        cp.wait()

    @pl.when(r == n_r - 1)
    def _():
        halo_ref[1] = jnp.zeros((W, Cin), jnp.float32)

    xt = x_tile_ref[0]                 # (TH, W, Cin) interior rows (pipelined)
    top = halo_ref[0:1]                # (1, W, Cin) row r*TH - 1 (or zeros)
    bot = halo_ref[1:2]                # (1, W, Cin) row r*TH + TH (or zeros)

    # dy-shifted row slabs (only 1 halo row of extra copy each).
    slabs = (
        jnp.concatenate([top, xt[:TH - 1]], axis=0),   # input rows y - 1
        xt,                                            # input rows y
        jnp.concatenate([xt[1:], bot], axis=0),        # input rows y + 1
    )

    # --- 3x3 conv: 3 accumulating MXU matmuls (K = 3*Cin) into an f32 acc ----
    zcol = jnp.zeros((TH, 1, Cin), jnp.float32)
    acc = jnp.zeros((TH * W, RPN_MID), jnp.float32)
    for dy in range(3):
        s = slabs[dy]
        left = jnp.concatenate([zcol, s[:, :W - 1, :]], axis=1)    # col x - 1
        right = jnp.concatenate([s[:, 1:, :], zcol], axis=1)       # col x + 1
        patches = jnp.concatenate([left, s, right], axis=-1)       # (TH, W, 3*Cin)
        patches = patches.reshape(TH * W, 3 * Cin).astype(jnp.bfloat16)
        acc = acc + jnp.dot(patches, wc_ref[dy],
                            preferred_element_type=jnp.float32)

    act = jnp.maximum(acc + bc_ref[...], 0.0).astype(jnp.bfloat16)   # (TH*W, 512)

    # --- merged 1x1 heads: one lane-dense matmul ------------------------------
    head = jnp.dot(act, wh_ref[...], preferred_element_type=jnp.float32)
    head = head + bh_ref[...]                                        # (TH*W, 128)

    # --- paired (bg, fg) softmax == sigmoid of the logit difference ----------
    lane = jax.lax.broadcasted_iota(jnp.int32, head.shape, 1)
    sig = pl.reciprocal(1.0 + jnp.exp(-head), approx=True)
    out = jnp.where(lane < 2 * A, sig, head)

    o_ref[0] = out.reshape(TH, W, HEAD_SLAB).astype(o_ref.dtype)


# ------------------------------ kernel wrapper --------------------------------
def _pick_row_tile(H, W):
    """Largest proper divisor of H giving <= 512 output rows per tile.

    Keeps the per-step working set well inside v7x's 64 MiB VMEM, keeps the
    MXU M dim well fed, and guarantees >= 2 grid steps for megacore even at
    B == 1.  Falls back to the full height if H has no suitable divisor.
    """
    best = H
    for cand in range(2, H):
        if H % cand == 0 and cand * W <= 512:
            best = cand
    return best


def rpn_fused(x_nhwc, wc, bc, w_heads, b_heads, row_tile=None):
    """x_nhwc: (B, H, W, Cin) f32 -> (B, H, W, 128) bf16 slab."""
    B, H, W, Cin = x_nhwc.shape
    TH = row_tile if row_tile is not None else _pick_row_tile(H, W)
    # TODO(synk): ragged H (H % TH != 0) needs a padded / BoundedSlice last tile.
    assert H % TH == 0
    n_rows = H // TH

    return pl.pallas_call(
        fused_rpn_kernel,
        out_shape=jax.ShapeDtypeStruct((B, H, W, HEAD_SLAB), jnp.bfloat16),
        grid=(B, n_rows),
        in_specs=[
            # interior rows of the tile: auto-pipelined (overlaps previous
            # tile's compute with this tile's HBM fetch)
            pl.BlockSpec((1, TH, W, Cin), lambda b, r: (b, r, 0, 0)),
            # same array again as a raw HBM ref, for the 1-row halo DMAs
            pl.BlockSpec(memory_space=pl.ANY),
            # weights / biases: whole-array VMEM residents (single-buffered,
            # copied in once for the whole call)
            pl.BlockSpec(memory_space=pltpu.MemorySpace.VMEM),
            pl.BlockSpec(memory_space=pltpu.MemorySpace.VMEM),
            pl.BlockSpec(memory_space=pltpu.MemorySpace.VMEM),
            pl.BlockSpec(memory_space=pltpu.MemorySpace.VMEM),
        ],
        out_specs=pl.BlockSpec((1, TH, W, HEAD_SLAB), lambda b, r: (b, r, 0, 0)),
        scratch_shapes=[
            pltpu.VMEM((2, W, Cin), jnp.float32),     # halo rows
            pltpu.SemaphoreType.DMA((2,)),
        ],
        compiler_params=pltpu.CompilerParams(
            dimension_semantics=("parallel", "parallel"),
            # 48 MiB: headroom under v7x's 64 MiB physical VMEM; plenty on
            # v5e/v6e (128 MiB physical).
            vmem_limit_bytes=48 * 1024 * 1024,
        ),
    )(x_nhwc, x_nhwc, wc, bc, w_heads, b_heads)


def prepare_params(raw):
    """Fold the three conv layers into the matrices the kernel wants.

    Called ONCE at model-load time (hoisted out of the per-forward path).
    PyTorch checkpoint mapping:
      RPN_Conv.weight      (512, Cin, 3, 3) OIHW -> transpose to (3, 3, Cin, 512)
      RPN_cls_score.weight (2A, 512, 1, 1)       -> squeeze/transpose to (512, 2A)
      RPN_bbox_pred.weight (4A, 512, 1, 1)       -> squeeze/transpose to (512, 4A)
    """
    A = NUM_ANCHORS
    w_conv = raw["w_conv"]                           # (3, 3, Cin, 512) HWIO
    cin = w_conv.shape[2]
    wc = w_conv.reshape(3, 3 * cin, RPN_MID).astype(jnp.bfloat16)
    bc = raw["b_conv"].astype(jnp.float32).reshape(1, RPN_MID)

    w_cls, b_cls = raw["w_cls"], raw["b_cls"]        # (512, 2A), (2A,)
    w_bbox, b_bbox = raw["w_bbox"], raw["b_bbox"]    # (512, 4A), (4A,)
    w_diff = w_cls[:, A:] - w_cls[:, :A]             # fg - bg
    b_diff = b_cls[A:] - b_cls[:A]
    w_heads = jnp.concatenate([-w_diff, w_diff, w_bbox], axis=1)    # (512, 6A)
    b_heads = jnp.concatenate([-b_diff, b_diff, b_bbox], axis=0)    # (6A,)
    pad = HEAD_SLAB - w_heads.shape[1]
    w_heads = jnp.pad(w_heads, ((0, 0), (0, pad))).astype(jnp.bfloat16)
    b_heads = jnp.pad(b_heads, (0, pad)).astype(jnp.float32).reshape(1, HEAD_SLAB)
    return {
        "wc": wc, "bc": bc, "w_heads": w_heads, "b_heads": b_heads,
        "base_anchors": generate_anchors(),
    }


# ---------------------------- proposal layer (glue) ----------------------------
def _whctrs(anchor):
    w = anchor[2] - anchor[0] + 1.0
    h = anchor[3] - anchor[1] + 1.0
    x_ctr = anchor[0] + 0.5 * (w - 1.0)
    y_ctr = anchor[1] + 0.5 * (h - 1.0)
    return w, h, x_ctr, y_ctr


def _mkanchors(ws, hs, x_ctr, y_ctr):
    return jnp.stack([x_ctr - 0.5 * (ws - 1.0), y_ctr - 0.5 * (hs - 1.0),
                      x_ctr + 0.5 * (ws - 1.0), y_ctr + 0.5 * (hs - 1.0)], axis=-1)


def generate_anchors(base_size=16, ratios=ANCHOR_RATIOS, scales=ANCHOR_SCALES):
    base_anchor = jnp.array([0.0, 0.0, base_size - 1.0, base_size - 1.0], jnp.float32)
    w, h, x_ctr, y_ctr = _whctrs(base_anchor)
    size = w * h
    ratios_a = jnp.array(ratios, jnp.float32)
    ws = jnp.round(jnp.sqrt(size / ratios_a))
    hs = jnp.round(ws * ratios_a)
    ratio_anchors = _mkanchors(ws, hs, x_ctr, y_ctr)
    scales_a = jnp.array(scales, jnp.float32)
    out = []
    for i in range(ratio_anchors.shape[0]):
        wi, hi, xc, yc = _whctrs(ratio_anchors[i])
        out.append(_mkanchors(wi * scales_a, hi * scales_a, xc, yc))
    return jnp.concatenate(out, axis=0)            # (A, 4)


def bbox_transform_inv(anchors, deltas):
    widths = anchors[..., 2] - anchors[..., 0] + 1.0
    heights = anchors[..., 3] - anchors[..., 1] + 1.0
    ctr_x = anchors[..., 0] + 0.5 * widths
    ctr_y = anchors[..., 1] + 0.5 * heights
    dx, dy, dw, dh = (deltas[..., 0], deltas[..., 1], deltas[..., 2], deltas[..., 3])
    pred_ctr_x = dx * widths + ctr_x
    pred_ctr_y = dy * heights + ctr_y
    pred_w = jnp.exp(dw) * widths
    pred_h = jnp.exp(dh) * heights
    return jnp.stack([pred_ctr_x - 0.5 * pred_w, pred_ctr_y - 0.5 * pred_h,
                      pred_ctr_x + 0.5 * pred_w, pred_ctr_y + 0.5 * pred_h], axis=-1)


def clip_boxes(boxes, im_info):
    h = im_info[:, 0][:, None]
    w = im_info[:, 1][:, None]
    x1 = jnp.clip(boxes[..., 0], 0.0, w - 1.0)
    y1 = jnp.clip(boxes[..., 1], 0.0, h - 1.0)
    x2 = jnp.clip(boxes[..., 2], 0.0, w - 1.0)
    y2 = jnp.clip(boxes[..., 3], 0.0, h - 1.0)
    return jnp.stack([x1, y1, x2, y2], axis=-1)


def proposal_layer(fg_scores, bbox_pred, im_info, base_anchors,
                   feat_stride=FEAT_STRIDE, post_nms_top_n=POST_NMS_TOP_N):
    """fg_scores: (B, H, W, A) fg probabilities; bbox_pred: (B, H, W, 4A)."""
    B, H, W, A = fg_scores.shape
    shift_x = jnp.arange(W, dtype=jnp.float32) * feat_stride
    shift_y = jnp.arange(H, dtype=jnp.float32) * feat_stride
    sx, sy = jnp.meshgrid(shift_x, shift_y)
    shifts = jnp.stack([sx.ravel(), sy.ravel(), sx.ravel(), sy.ravel()], axis=1)
    anchors = (shifts[:, None, :] + base_anchors[None, :, :]).reshape(1, -1, 4)

    scores = fg_scores.reshape(B, -1)
    deltas = bbox_pred.reshape(B, H * W * A, 4)

    proposals = bbox_transform_inv(anchors, deltas)
    proposals = clip_boxes(proposals, im_info)

    # TODO(synk): greedy NMS of _ProposalLayer has no clean Pallas/TPU
    # equivalent here; proposals are ranked by fg score only (top-k).
    n = min(post_nms_top_n, scores.shape[1])
    _, top_idx = jax.lax.top_k(scores, n)
    top_props = jnp.take_along_axis(proposals, top_idx[..., None], axis=1)
    batch_ind = jnp.broadcast_to(
        jnp.arange(B, dtype=jnp.float32)[:, None, None], (B, n, 1))
    return jnp.concatenate([batch_ind, top_props], axis=2)     # (B, n, 5)


# --------------------------------- full RPN -----------------------------------
def rpn_forward(base_feat_nhwc, im_info, prepared, gt_boxes=None, num_boxes=None):
    """Mirror of _RPN.forward in eval mode. Returns (rois, 0.0, 0.0).

    base_feat_nhwc is channels-last; the backbone should emit NHWC directly
    (a PyTorch NCHW tensor needs one upstream transpose).
    """
    slab = rpn_fused(base_feat_nhwc, prepared["wc"], prepared["bc"],
                     prepared["w_heads"], prepared["b_heads"])   # (B, H, W, 128) bf16
    A = NUM_ANCHORS
    fg_scores = slab[..., A:2 * A].astype(jnp.float32)
    bbox_pred = slab[..., 2 * A:6 * A].astype(jnp.float32)
    rois = proposal_layer(fg_scores, bbox_pred, im_info, prepared["base_anchors"])
    # TODO(synk): training path (anchor targets, cross-entropy, smooth-L1, raw
    # cls_score) not implemented — eval mode returns zero losses like the module.
    return rois, jnp.float32(0.0), jnp.float32(0.0)


# ------------------------- pure-JAX reference (check) --------------------------
def rpn_heads_reference(x_nhwc, raw):
    act = jax.lax.conv_general_dilated(
        x_nhwc, raw["w_conv"], window_strides=(1, 1), padding="SAME",
        dimension_numbers=("NHWC", "HWIO", "NHWC"))
    act = jnp.maximum(act + raw["b_conv"], 0.0)
    cls = jnp.einsum("bhwc,co->bhwo", act, raw["w_cls"]) + raw["b_cls"]
    bbox = jnp.einsum("bhwc,co->bhwo", act, raw["w_bbox"]) + raw["b_bbox"]
    A = NUM_ANCHORS
    bg, fg = cls[..., :A], cls[..., A:]
    fg_prob = jnp.exp(fg) / (jnp.exp(fg) + jnp.exp(bg))          # paired softmax
    return fg_prob, bbox


# ----------------------------------- main --------------------------------------
if __name__ == "__main__":
    B, DIN, H, W = 2, 16, 16, 16

    key = jax.random.PRNGKey(0)
    k0, k1, k2, k3 = jax.random.split(key, 4)

    raw = {
        "w_conv": jax.random.normal(k1, (3, 3, DIN, RPN_MID), jnp.float32) * 0.01,
        "b_conv": jnp.zeros((RPN_MID,), jnp.float32),
        "w_cls": jax.random.normal(k2, (RPN_MID, NC_SCORE_OUT), jnp.float32) * 0.01,
        "b_cls": jnp.zeros((NC_SCORE_OUT,), jnp.float32),
        "w_bbox": jax.random.normal(k3, (RPN_MID, NC_BBOX_OUT), jnp.float32) * 0.01,
        "b_bbox": jnp.zeros((NC_BBOX_OUT,), jnp.float32),
    }
    # Hoisted out of the per-forward path: runs once at "model load" time.
    prepared = prepare_params(raw)

    base_feat_nchw = jax.random.normal(k0, (B, DIN, H, W), jnp.float32)  # PyTorch NCHW
    # One-off transpose only because the reference module is NCHW; a production
    # backbone should hand this kernel NHWC directly.
    base_feat = jnp.transpose(base_feat_nchw, (0, 2, 3, 1))              # (B, H, W, Cin)
    im_info = jnp.array([[H * FEAT_STRIDE, W * FEAT_STRIDE, 1.0]] * B, jnp.float32)

    # --- correctness check of the fused slab against a pure-JAX reference ----
    slab = jax.block_until_ready(
        rpn_fused(base_feat, prepared["wc"], prepared["bc"],
                  prepared["w_heads"], prepared["b_heads"]))
    A = NUM_ANCHORS
    fg_k = slab[..., A:2 * A].astype(jnp.float32)
    bb_k = slab[..., 2 * A:6 * A].astype(jnp.float32)
    fg_r, bb_r = rpn_heads_reference(base_feat, raw)
    assert float(jnp.max(jnp.abs(fg_k - fg_r))) < 1e-2
    assert float(jnp.max(jnp.abs(bb_k - bb_r))) < 1e-2

    # --- full forward (jitted) -------------------------------------------------
    fwd = jax.jit(rpn_forward)
    rois, loss_cls, loss_box = fwd(base_feat, im_info, prepared)
    rois = jax.block_until_ready(rois)
    assert rois.shape == (B, POST_NMS_TOP_N, 5)
    assert bool(jnp.all(jnp.isfinite(rois)))
    print("KERNEL_OK")
</pallas_src>

<mosaic_0001>
module attributes {stable_mosaic.version = 11 : i64} {
  func.func @fused_rpn_kernel(%arg0: i32, %arg1: i32, %arg2: memref<1x8x16x16xf32, #tpu.memory_space<vmem>>, %arg3: memref<2x16x16x16xf32, #tpu.memory_space<any>>, %arg4: memref<3x48x512xbf16, #tpu.memory_space<vmem>>, %arg5: memref<1x512xf32, #tpu.memory_space<vmem>>, %arg6: memref<512x128xbf16, #tpu.memory_space<vmem>>, %arg7: memref<1x128xf32, #tpu.memory_space<vmem>>, %arg8: memref<1x8x16x128xbf16, #tpu.memory_space<vmem>>, %arg9: memref<2x16x16xf32, #tpu.memory_space<vmem>>, %arg10: memref<2x!tpu.dma_semaphore, #tpu.memory_space<semaphore_mem>>) attributes {dimension_semantics = [#tpu.dimension_semantics<parallel>, #tpu.dimension_semantics<parallel>], iteration_bounds = array<i64: 2, 2>, scalar_prefetch = 0 : i64, scratch_operands = 2 : i64, tpu.core_type = #tpu.core_type<tc>, window_params = [{transform_indices = @transform_0, window_bounds = array<i64: 1, 8, 16, 16>}, {}, {pipeline_mode = #tpu.pipeline_mode<synchronous>, transform_indices = @transform_2, window_bounds = array<i64: 3, 48, 512>}, {pipeline_mode = #tpu.pipeline_mode<synchronous>, transform_indices = @transform_3, window_bounds = array<i64: 1, 512>}, {pipeline_mode = #tpu.pipeline_mode<synchronous>, transform_indices = @transform_4, window_bounds = array<i64: 512, 128>}, {pipeline_mode = #tpu.pipeline_mode<synchronous>, transform_indices = @transform_5, window_bounds = array<i64: 1, 128>}, {transform_indices = @transform_6, window_bounds = array<i64: 1, 8, 16, 128>}]} {
    %c0_i32 = arith.constant 0 : i32
    %0 = arith.cmpi sgt, %arg1, %c0_i32 : i32
    %1 = arith.extui %0 : i1 to i32
    %c0_i32_0 = arith.constant 0 : i32
    %2 = arith.cmpi ne, %1, %c0_i32_0 : i32
    scf.if %2 {
      %c8_i32 = arith.constant 8 : i32
      %81 = arith.muli %arg1, %c8_i32 : i32
      %c1_i32_40 = arith.constant 1 : i32
      %82 = arith.subi %81, %c1_i32_40 : i32
      %c0_i32_41 = arith.constant 0 : i32
      %c0_i32_42 = arith.constant 0 : i32
      %c0_i32_43 = arith.constant 0 : i32
      %c0_i32_44 = arith.constant 0 : i32
      %83 = tpu.memref_slice %arg3[%arg0, %82, %c0_i32_43, %c0_i32_44] : memref<2x16x16x16xf32, #tpu.memory_space<any>> -> memref<1x1x16x16xf32, #tpu.memory_space<any>>
      %84 = tpu.memref_squeeze %83 : memref<1x1x16x16xf32, #tpu.memory_space<any>> -> memref<16x16xf32, #tpu.memory_space<any>>
      %c0_i32_45 = arith.constant 0 : i32
      %c0_i32_46 = arith.constant 0 : i32
      %85 = tpu.memref_slice %arg9[%c0_i32_41, %c0_i32_45, %c0_i32_46] : memref<2x16x16xf32, #tpu.memory_space<vmem>> -> memref<1x16x16xf32, #tpu.memory_space<vmem>>
      %86 = tpu.memref_squeeze %85 : memref<1x16x16xf32, #tpu.memory_space<vmem>> -> memref<16x16xf32, #tpu.memory_space<vmem>>
      %87 = tpu.memref_slice %arg10[%c0_i32_42] : memref<2x!tpu.dma_semaphore, #tpu.memory_space<semaphore_mem>> -> memref<1x!tpu.dma_semaphore, #tpu.memory_space<semaphore_mem>>
      %88 = tpu.memref_squeeze %87 : memref<1x!tpu.dma_semaphore, #tpu.memory_space<semaphore_mem>> -> memref<!tpu.dma_semaphore, #tpu.memory_space<semaphore_mem>>
      tpu.enqueue_dma source(%84 : memref<16x16xf32, #tpu.memory_space<any>>) target(%86 : memref<16x16xf32, #tpu.memory_space<vmem>>) target_semaphore(%88 : memref<!tpu.dma_semaphore, #tpu.memory_space<semaphore_mem>>)
      %c0_i32_47 = arith.constant 0 : i32
      %c0_i32_48 = arith.constant 0 : i32
      %c0_i32_49 = arith.constant 0 : i32
      %c0_i32_50 = arith.constant 0 : i32
      %89 = tpu.memref_slice %arg3[%arg0, %82, %c0_i32_49, %c0_i32_50] : memref<2x16x16x16xf32, #tpu.memory_space<any>> -> memref<1x1x16x16xf32, #tpu.memory_space<any>>
      %90 = tpu.memref_squeeze %89 : memref<1x1x16x16xf32, #tpu.memory_space<any>> -> memref<16x16xf32, #tpu.memory_space<any>>
      %c0_i32_51 = arith.constant 0 : i32
      %c0_i32_52 = arith.constant 0 : i32
      %91 = tpu.memref_slice %arg9[%c0_i32_47, %c0_i32_51, %c0_i32_52] : memref<2x16x16xf32, #tpu.memory_space<vmem>> -> memref<1x16x16xf32, #tpu.memory_space<vmem>>
      %92 = tpu.memref_squeeze %91 : memref<1x16x16xf32, #tpu.memory_space<vmem>> -> memref<16x16xf32, #tpu.memory_space<vmem>>
      %93 = tpu.memref_slice %arg10[%c0_i32_48] : memref<2x!tpu.dma_semaphore, #tpu.memory_space<semaphore_mem>> -> memref<1x!tpu.dma_semaphore, #tpu.memory_space<semaphore_mem>>
      %94 = tpu.memref_squeeze %93 : memref<1x!tpu.dma_semaphore, #tpu.memory_space<semaphore_mem>> -> memref<!tpu.dma_semaphore, #tpu.memory_space<semaphore_mem>>
      tpu.wait_dma2 semaphore(%94 : memref<!tpu.dma_semaphore, #tpu.memory_space<semaphore_mem>>) src(%90 : memref<16x16xf32, #tpu.memory_space<any>>) dst(%92 : memref<16x16xf32, #tpu.memory_space<vmem>>)
    } else {
    }
    %c0_i32_1 = arith.constant 0 : i32
    %3 = arith.cmpi eq, %arg1, %c0_i32_1 : i32
    %4 = arith.extui %3 : i1 to i32
    %c0_i32_2 = arith.constant 0 : i32
    %5 = arith.cmpi ne, %4, %c0_i32_2 : i32
    scf.if %5 {
      %cst_40 = arith.constant 0.000000e+00 : f32
      %81 = vector.broadcast %cst_40 : f32 to vector<16x16xf32>
      %c0_41 = arith.constant 0 : index
      %c0_42 = arith.constant 0 : index
      %c0_43 = arith.constant 0 : index
      %82 = vector.load %arg9[%c0_41, %c0_42, %c0_43] : memref<2x16x16xf32, #tpu.memory_space<vmem>>, vector<1x16x16xf32>
      %83 = vector.shape_cast %82 : vector<1x16x16xf32> to vector<16x16xf32>
      %84 = vector.shape_cast %81 : vector<16x16xf32> to vector<1x16x16xf32>
      tpu.vector_store %arg9[%c0_41, %c0_42, %c0_43], %84 {strides = array<i32>} : memref<2x16x16xf32, #tpu.memory_space<vmem>>, vector<1x16x16xf32>,
    } else {
    }
    %c1_i32 = arith.constant 1 : i32
    %6 = arith.cmpi slt, %arg1, %c1_i32 : i32
    %7 = arith.extui %6 : i1 to i32
    %c0_i32_3 = arith.constant 0 : i32
    %8 = arith.cmpi ne, %7, %c0_i32_3 : i32
    scf.if %8 {
      %c1_i32_40 = arith.constant 1 : i32
      %81 = arith.addi %arg1, %c1_i32_40 : i32
      %c8_i32 = arith.constant 8 : i32
      %82 = arith.muli %81, %c8_i32 : i32
      %c1_i32_41 = arith.constant 1 : i32
      %c1_i32_42 = arith.constant 1 : i32
      %c0_i32_43 = arith.constant 0 : i32
      %c0_i32_44 = arith.constant 0 : i32
      %83 = tpu.memref_slice %arg3[%arg0, %82, %c0_i32_43, %c0_i32_44] : memref<2x16x16x16xf32, #tpu.memory_space<any>> -> memref<1x1x16x16xf32, #tpu.memory_space<any>>
      %84 = tpu.memref_squeeze %83 : memref<1x1x16x16xf32, #tpu.memory_space<any>> -> memref<16x16xf32, #tpu.memory_space<any>>
      %c0_i32_45 = arith.constant 0 : i32
      %c0_i32_46 = arith.constant 0 : i32
      %85 = tpu.memref_slice %arg9[%c1_i32_41, %c0_i32_45, %c0_i32_46] : memref<2x16x16xf32, #tpu.memory_space<vmem>> -> memref<1x16x16xf32, #tpu.memory_space<vmem>>
      %86 = tpu.memref_squeeze %85 : memref<1x16x16xf32, #tpu.memory_space<vmem>> -> memref<16x16xf32, #tpu.memory_space<vmem>>
      %87 = tpu.memref_slice %arg10[%c1_i32_42] : memref<2x!tpu.dma_semaphore, #tpu.memory_space<semaphore_mem>> -> memref<1x!tpu.dma_semaphore, #tpu.memory_space<semaphore_mem>>
      %88 = tpu.memref_squeeze %87 : memref<1x!tpu.dma_semaphore, #tpu.memory_space<semaphore_mem>> -> memref<!tpu.dma_semaphore, #tpu.memory_space<semaphore_mem>>
      tpu.enqueue_dma source(%84 : memref<16x16xf32, #tpu.memory_space<any>>) target(%86 : memref<16x16xf32, #tpu.memory_space<vmem>>) target_semaphore(%88 : memref<!tpu.dma_semaphore, #tpu.memory_space<semaphore_mem>>)
      %c1_i32_47 = arith.constant 1 : i32
      %c1_i32_48 = arith.constant 1 : i32
      %c0_i32_49 = arith.constant 0 : i32
      %c0_i32_50 = arith.constant 0 : i32
      %89 = tpu.memref_slice %arg3[%arg0, %82, %c0_i32_49, %c0_i32_50] : memref<2x16x16x16xf32, #tpu.memory_space<any>> -> memref<1x1x16x16xf32, #tpu.memory_space<any>>
      %90 = tpu.memref_squeeze %89 : memref<1x1x16x16xf32, #tpu.memory_space<any>> -> memref<16x16xf32, #tpu.memory_space<any>>
      %c0_i32_51 = arith.constant 0 : i32
      %c0_i32_52 = arith.constant 0 : i32
      %91 = tpu.memref_slice %arg9[%c1_i32_47, %c0_i32_51, %c0_i32_52] : memref<2x16x16xf32, #tpu.memory_space<vmem>> -> memref<1x16x16xf32, #tpu.memory_space<vmem>>
      %92 = tpu.memref_squeeze %91 : memref<1x16x16xf32, #tpu.memory_space<vmem>> -> memref<16x16xf32, #tpu.memory_space<vmem>>
      %93 = tpu.memref_slice %arg10[%c1_i32_48] : memref<2x!tpu.dma_semaphore, #tpu.memory_space<semaphore_mem>> -> memref<1x!tpu.dma_semaphore, #tpu.memory_space<semaphore_mem>>
      %94 = tpu.memref_squeeze %93 : memref<1x!tpu.dma_semaphore, #tpu.memory_space<semaphore_mem>> -> memref<!tpu.dma_semaphore, #tpu.memory_space<semaphore_mem>>
      tpu.wait_dma2 semaphore(%94 : memref<!tpu.dma_semaphore, #tpu.memory_space<semaphore_mem>>) src(%90 : memref<16x16xf32, #tpu.memory_space<any>>) dst(%92 : memref<16x16xf32, #tpu.memory_space<vmem>>)
    } else {
    }
    %c1_i32_4 = arith.constant 1 : i32
    %9 = arith.cmpi eq, %arg1, %c1_i32_4 : i32
    %10 = arith.extui %9 : i1 to i32
    %c0_i32_5 = arith.constant 0 : i32
    %11 = arith.cmpi ne, %10, %c0_i32_5 : i32
    scf.if %11 {
      %cst_40 = arith.constant 0.000000e+00 : f32
      %81 = vector.broadcast %cst_40 : f32 to vector<16x16xf32>
      %c1_41 = arith.constant 1 : index
      %c0_42 = arith.constant 0 : index
      %c0_43 = arith.constant 0 : index
      %82 = vector.load %arg9[%c1_41, %c0_42, %c0_43] : memref<2x16x16xf32, #tpu.memory_space<vmem>>, vector<1x16x16xf32>
      %83 = vector.shape_cast %82 : vector<1x16x16xf32> to vector<16x16xf32>
      %84 = vector.shape_cast %81 : vector<16x16xf32> to vector<1x16x16xf32>
      tpu.vector_store %arg9[%c1_41, %c0_42, %c0_43], %84 {strides = array<i32>} : memref<2x16x16xf32, #tpu.memory_space<vmem>>, vector<1x16x16xf32>,
    } else {
    }
    %c0 = arith.constant 0 : index
    %c0_6 = arith.constant 0 : index
    %c0_7 = arith.constant 0 : index
    %c0_8 = arith.constant 0 : index
    %12 = vector.load %arg2[%c0, %c0_6, %c0_7, %c0_8] : memref<1x8x16x16xf32, #tpu.memory_space<vmem>>, vector<1x8x16x16xf32>
    %13 = vector.shape_cast %12 : vector<1x8x16x16xf32> to vector<8x16x16xf32>
    %c0_9 = arith.constant 0 : index
    %c0_10 = arith.constant 0 : index
    %c0_11 = arith.constant 0 : index
    %14 = vector.load %arg9[%c0_9, %c0_10, %c0_11] : memref<2x16x16xf32, #tpu.memory_space<vmem>>, vector<1x16x16xf32>
    %c1 = arith.constant 1 : index
    %c0_12 = arith.constant 0 : index
    %c0_13 = arith.constant 0 : index
    %15 = vector.load %arg9[%c1, %c0_12, %c0_13] : memref<2x16x16xf32, #tpu.memory_space<vmem>>, vector<1x16x16xf32>
    %16 = vector.extract_strided_slice %13 {offsets = [0, 0, 0], sizes = [7, 16, 16], strides = [1, 1, 1]} : vector<8x16x16xf32> to vector<7x16x16xf32>
    %17 = tpu.concatenate %14, %16 in 0 : vector<1x16x16xf32>, vector<7x16x16xf32> -> vector<8x16x16xf32>
    %18 = vector.extract_strided_slice %13 {offsets = [1, 0, 0], sizes = [7, 16, 16], strides = [1, 1, 1]} : vector<8x16x16xf32> to vector<7x16x16xf32>
    %19 = tpu.concatenate %18, %15 in 0 : vector<7x16x16xf32>, vector<1x16x16xf32> -> vector<8x16x16xf32>
    %cst = arith.constant 0.000000e+00 : f32
    %20 = vector.broadcast %cst : f32 to vector<8x1x16xf32>
    %cst_14 = arith.constant 0.000000e+00 : f32
    %21 = vector.broadcast %cst_14 : f32 to vector<128x512xf32>
    %22 = vector.extract_strided_slice %17 {offsets = [0, 0, 0], sizes = [8, 15, 16], strides = [1, 1, 1]} : vector<8x16x16xf32> to vector<8x15x16xf32>
    %23 = tpu.concatenate %20, %22 in 1 : vector<8x1x16xf32>, vector<8x15x16xf32> -> vector<8x16x16xf32>
    %24 = vector.extract_strided_slice %17 {offsets = [0, 1, 0], sizes = [8, 15, 16], strides = [1, 1, 1]} : vector<8x16x16xf32> to vector<8x15x16xf32>
    %25 = tpu.concatenate %24, %20 in 1 : vector<8x15x16xf32>, vector<8x1x16xf32> -> vector<8x16x16xf32>
    %26 = tpu.concatenate %23, %17, %25 in 2 : vector<8x16x16xf32>, vector<8x16x16xf32>, vector<8x16x16xf32> -> vector<8x16x48xf32>
    %27 = vector.shape_cast %26 : vector<8x16x48xf32> to vector<128x48xf32>
    %28 = arith.truncf %27 : vector<128x48xf32> to vector<128x48xbf16>
    %c0_15 = arith.constant 0 : index
    %c0_16 = arith.constant 0 : index
    %c0_17 = arith.constant 0 : index
    %29 = vector.load %arg4[%c0_15, %c0_16, %c0_17] : memref<3x48x512xbf16, #tpu.memory_space<vmem>>, vector<1x48x512xbf16>
    %30 = vector.shape_cast %29 : vector<1x48x512xbf16> to vector<48x512xbf16>
    %cst_18 = arith.constant dense<0.000000e+00> : vector<128x512xf32>
    %31 = tpu.matmul %28, %30, %cst_18 {dimension_numbers = #tpu.dot_dimension_numbers<[1], [0], [0], [1], [0, 0, 1, 1], [], []>} : vector<128x48xbf16>, vector<48x512xbf16>, vector<128x512xf32> -> vector<128x512xf32>
    %32 = arith.addf %21, %31 : vector<128x512xf32>
    %33 = vector.extract_strided_slice %13 {offsets = [0, 0, 0], sizes = [8, 15, 16], strides = [1, 1, 1]} : vector<8x16x16xf32> to vector<8x15x16xf32>
    %34 = tpu.concatenate %20, %33 in 1 : vector<8x1x16xf32>, vector<8x15x16xf32> -> vector<8x16x16xf32>
    %35 = vector.extract_strided_slice %13 {offsets = [0, 1, 0], sizes = [8, 15, 16], strides = [1, 1, 1]} : vector<8x16x16xf32> to vector<8x15x16xf32>
    %36 = tpu.concatenate %35, %20 in 1 : vector<8x15x16xf32>, vector<8x1x16xf32> -> vector<8x16x16xf32>
    %37 = tpu.concatenate %34, %13, %36 in 2 : vector<8x16x16xf32>, vector<8x16x16xf32>, vector<8x16x16xf32> -> vector<8x16x48xf32>
    %38 = vector.shape_cast %37 : vector<8x16x48xf32> to vector<128x48xf32>
    %39 = arith.truncf %38 : vector<128x48xf32> to vector<128x48xbf16>
    %c1_19 = arith.constant 1 : index
    %c0_20 = arith.constant 0 : index
    %c0_21 = arith.constant 0 : index
    %40 = vector.load %arg4[%c1_19, %c0_20, %c0_21] : memref<3x48x512xbf16, #tpu.memory_space<vmem>>, vector<1x48x512xbf16>
    %41 = vector.shape_cast %40 : vector<1x48x512xbf16> to vector<48x512xbf16>
    %cst_22 = arith.constant dense<0.000000e+00> : vector<128x512xf32>
    %42 = tpu.matmul %39, %41, %cst_22 {dimension_numbers = #tpu.dot_dimension_numbers<[1], [0], [0], [1], [0, 0, 1, 1], [], []>} : vector<128x48xbf16>, vector<48x512xbf16>, vector<128x512xf32> -> vector<128x512xf32>
    %43 = arith.addf %32, %42 : vector<128x512xf32>
    %44 = vector.extract_strided_slice %19 {offsets = [0, 0, 0], sizes = [8, 15, 16], strides = [1, 1, 1]} : vector<8x16x16xf32> to vector<8x15x16xf32>
    %45 = tpu.concatenate %20, %44 in 1 : vector<8x1x16xf32>, vector<8x15x16xf32> -> vector<8x16x16xf32>
    %46 = vector.extract_strided_slice %19 {offsets = [0, 1, 0], sizes = [8, 15, 16], strides = [1, 1, 1]} : vector<8x16x16xf32> to vector<8x15x16xf32>
    %47 = tpu.concatenate %46, %20 in 1 : vector<8x15x16xf32>, vector<8x1x16xf32> -> vector<8x16x16xf32>
    %48 = tpu.concatenate %45, %19, %47 in 2 : vector<8x16x16xf32>, vector<8x16x16xf32>, vector<8x16x16xf32> -> vector<8x16x48xf32>
    %49 = vector.shape_cast %48 : vector<8x16x48xf32> to vector<128x48xf32>
    %50 = arith.truncf %49 : vector<128x48xf32> to vector<128x48xbf16>
    %c2 = arith.constant 2 : index
    %c0_23 = arith.constant 0 : index
    %c0_24 = arith.constant 0 : index
    %51 = vector.load %arg4[%c2, %c0_23, %c0_24] : memref<3x48x512xbf16, #tpu.memory_space<vmem>>, vector<1x48x512xbf16>
    %52 = vector.shape_cast %51 : vector<1x48x512xbf16> to vector<48x512xbf16>
    %cst_25 = arith.constant dense<0.000000e+00> : vector<128x512xf32>
    %53 = tpu.matmul %50, %52, %cst_25 {dimension_numbers = #tpu.dot_dimension_numbers<[1], [0], [0], [1], [0, 0, 1, 1], [], []>} : vector<128x48xbf16>, vector<48x512xbf16>, vector<128x512xf32> -> vector<128x512xf32>
    %54 = arith.addf %43, %53 : vector<128x512xf32>
    %c0_26 = arith.constant 0 : index
    %c0_27 = arith.constant 0 : index
    %55 = vector.load %arg5[%c0_26, %c0_27] : memref<1x512xf32, #tpu.memory_space<vmem>>, vector<1x512xf32>
    %56 = vector.broadcast %55 : vector<1x512xf32> to vector<128x512xf32>
    %57 = arith.addf %54, %56 : vector<128x512xf32>
    %cst_28 = arith.constant 0.000000e+00 : f32
    %58 = vector.broadcast %cst_28 : f32 to vector<128x512xf32>
    %59 = arith.maximumf %57, %58 : vector<128x512xf32>
    %60 = arith.truncf %59 : vector<128x512xf32> to vector<128x512xbf16>
    %c0_29 = arith.constant 0 : index
    %c0_30 = arith.constant 0 : index
    %61 = vector.load %arg6[%c0_29, %c0_30] : memref<512x128xbf16, #tpu.memory_space<vmem>>, vector<512x128xbf16>
    %cst_31 = arith.constant dense<0.000000e+00> : vector<128x128xf32>
    %62 = tpu.matmul %60, %61, %cst_31 {dimension_numbers = #tpu.dot_dimension_numbers<[1], [0], [0], [1], [0, 0, 1, 1], [], []>} : vector<128x512xbf16>, vector<512x128xbf16>, vector<128x128xf32> -> vector<128x128xf32>
    %c0_32 = arith.constant 0 : index
    %c0_33 = arith.constant 0 : index
    %63 = vector.load %arg7[%c0_32, %c0_33] : memref<1x128xf32, #tpu.memory_space<vmem>>, vector<1x128xf32>
    %64 = vector.broadcast %63 : vector<1x128xf32> to vector<128x128xf32>
    %65 = arith.addf %62, %64 : vector<128x128xf32>
    %66 = tpu.iota {dimensions = array<i32: 1>} : vector<128x128xi32>
    %cst_34 = arith.constant 0.000000e+00 : f32
    %67 = vector.broadcast %cst_34 : f32 to vector<128x128xf32>
    %68 = arith.subf %67, %65 : vector<128x128xf32>
    %69 = math.exp %68 : vector<128x128xf32>
    %cst_35 = arith.constant 1.000000e+00 : f32
    %70 = vector.broadcast %cst_35 : f32 to vector<128x128xf32>
    %71 = arith.addf %70, %69 : vector<128x128xf32>
    %72 = tpu.reciprocal %71 {approx = true} : vector<128x128xf32> -> vector<128x128xf32>
    %c18_i32 = arith.constant 18 : i32
    %73 = vector.broadcast %c18_i32 : i32 to vector<128x128xi32>
    %74 = arith.cmpi slt, %66, %73 : vector<128x128xi32>
    %75 = arith.select %74, %72, %65 : vector<128x128xi1>, vector<128x128xf32>
    %76 = vector.shape_cast %75 : vector<128x128xf32> to vector<8x16x128xf32>
    %77 = arith.truncf %76 : vector<8x16x128xf32> to vector<8x16x128xbf16>
    %c0_36 = arith.constant 0 : index
    %c0_37 = arith.constant 0 : index
    %c0_38 = arith.constant 0 : index
    %c0_39 = arith.constant 0 : index
    %78 = vector.load %arg8[%c0_36, %c0_37, %c0_38, %c0_39] : memref<1x8x16x128xbf16, #tpu.memory_space<vmem>>, vector<1x8x16x128xbf16>
    %79 = vector.shape_cast %78 : vector<1x8x16x128xbf16> to vector<8x16x128xbf16>
    %80 = vector.shape_cast %77 : vector<8x16x128xbf16> to vector<1x8x16x128xbf16>
    tpu.vector_store %arg8[%c0_36, %c0_37, %c0_38, %c0_39], %80 {strides = array<i32>} : memref<1x8x16x128xbf16, #tpu.memory_space<vmem>>, vector<1x8x16x128xbf16>,
    return
  }
  func.func @transform_0(%arg0: i32, %arg1: i32) -> (i32, i32, i32, i32) {
    %c0_i32 = arith.constant 0 : i32
    %c0_i32_0 = arith.constant 0 : i32
    %c0_i32_1 = arith.constant 0 : i32
    return %arg0, %arg1, %c0_i32, %c0_i32_0 : i32, i32, i32, i32
  }
  func.func @transform_2(%arg0: i32, %arg1: i32) -> (i32, i32, i32) {
    %c0_i32 = arith.constant 0 : i32
    %c0_i32_0 = arith.constant 0 : i32
    %c0_i32_1 = arith.constant 0 : i32
    %c0_i32_2 = arith.constant 0 : i32
    return %c0_i32, %c0_i32_0, %c0_i32_1 : i32, i32, i32
  }
  func.func @transform_3(%arg0: i32, %arg1: i32) -> (i32, i32) {
    %c0_i32 = arith.constant 0 : i32
    %c0_i32_0 = arith.constant 0 : i32
    %c0_i32_1 = arith.constant 0 : i32
    return %c0_i32, %c0_i32_0 : i32, i32
  }
  func.func @transform_4(%arg0: i32, %arg1: i32) -> (i32, i32) {
    %c0_i32 = arith.constant 0 : i32
    %c0_i32_0 = arith.constant 0 : i32
    %c0_i32_1 = arith.constant 0 : i32
    return %c0_i32, %c0_i32_0 : i32, i32
  }
  func.func @transform_5(%arg0: i32, %arg1: i32) -> (i32, i32) {
    %c0_i32 = arith.constant 0 : i32
    %c0_i32_0 = arith.constant 0 : i32
    %c0_i32_1 = arith.constant 0 : i32
    return %c0_i32, %c0_i32_0 : i32, i32
  }
  func.func @transform_6(%arg0: i32, %arg1: i32) -> (i32, i32, i32, i32) {
    %c0_i32 = arith.constant 0 : i32
    %c0_i32_0 = arith.constant 0 : i32
    %c0_i32_1 = arith.constant 0 : i32
    return %arg0, %arg1, %c0_i32, %c0_i32_0 : i32, i32, i32, i32
  }
}

</mosaic_0001>

<bundles_post_ra>
// kernel: tpu_custom_call.1
= control target key start
LH: loop header
LB: loop body
LE: loop exit
PB: predicated region body
PF: predicated region fallthrough
CT: control target
= control target key end

     0   :  { %s4805_s0 = inlined_call_operand.hbm [shape: f32[2,16,16,16], index: 0, kind: input, shape index: {}]   ;;  %s4806_s1 = inlined_call_operand.hbm [shape: f32[2,16,16,16], index: 1, kind: input, shape index: {}]   ;;  %s4807_s2 = inlined_call_operand.hbm [shape: bf16[3,48,512], index: 2, kind: input, shape index: {}]   ;;  %s4808_s3 = inlined_call_operand.vmem [shape: f32[1,512], index: 3, kind: input, shape index: {}]   ;;  %s4809_s4 = inlined_call_operand.hbm [shape: bf16[512,128], index: 4, kind: input, shape index: {}]   ;;  %s4810_s5 = inlined_call_operand.vmem [shape: f32[1,128], index: 5, kind: input, shape index: {}]   ;;  %s4811_s6 = inlined_call_operand.hbm [shape: bf16[2,16,16,128], index: 6, kind: output, shape index: {}]  }
   0x1   :  { %4824 = sst [smem:[#allocation26_spill]] %s4807_s2 }
   0x2   :  { %4825 = sst [smem:[#allocation27_spill]] %s4809_s4 }
   0x3   :  { %4826 = sst [smem:[#allocation28_spill]] %s4810_s5 }
   0x4   :  { %4827 = sst [smem:[#allocation29_spill]] %s4811_s6 }
   0x5   :  { %11 = vsyncpa [#allocation5], 0 }
   0x6   :  { %13 = vsyncpa [#allocation5 + $0x1], 0 }
   0x7   :  { %14 = vsyncpa [#allocation8], 0 }
   0x8   :  { %15 = vsyncpa [#allocation6], 0 }
   0x9   :  { %17 = vsyncpa [#allocation6 + $0x1], 0  ;;  %s3828_s21 = smov 0   ;;  %s3830_s22 = smov 0  }
   0xa   :  { %s3832_s23 = smov 0   ;;  %s3834_s24 = smov 0  }
   0xb   :  { %s3836_s25 = smov 0   ;;  %s3838_s26 = smov 0  }
   0xc   :  { %s3840_s27 = smov 0   ;;  %s3842_s28 = smov 0  }
   0xd LB: > { %4828 = sst [smem:[#allocation22_spill]] %s3744_s21  ;;  %s2656_s29 = sadd.s32 4294967295, %s3772_s28   ;;  %s3772_s28 = sphi %s3842_s28, %s23_s28   ;;  %s3768_s27 = sphi %s3840_s27, %s4862_s27   ;;  %s3764_s26 = sphi %s3838_s26, %s4861_s26   ;;  %s3760_s25 = sphi %s3836_s25, %s4860_s25   ;;  %s3756_s24 = sphi %s3834_s24, %s4859_s24   ;;  %s3752_s23 = sphi %s3832_s23, %s4858_s23   ;;  %s3748_s22 = sphi %s3830_s22, %s4857_s22   ;;  %s3744_s21 = sphi %s3828_s21, %s4856_s21  }
   0xe   : > { %s2657_s30 = sadd.s32 4294967294, %s3772_s28   ;;  %p57_p0 = scmp.ne.s32.totalorder %s3748_s22, %s3744_s21 }
   0xf   : > { %p3872_p1 = scmp.eq.s32.totalorder %s2656_s29, 0  ;;  %p3876_p2 = scmp.eq.s32.totalorder %s2656_s29, 3 }
  0x10   : > { %p173_p3 = scmp.eq.s32.totalorder %s2657_s30, 3  ;;  %p2658_p5 = scmp.ge.s32.totalorder %s3772_s28, 1 }
  0x11   : > { %s4829_s7 = scalar_select %p3872_p1, 1, 0 }
  0x12   : > { %s4830_s8 = scalar_select %p3876_p2, 1, 0 }
  0x13   : > { %p3882_p4 = por %p3872_p1, %p57_p0  ;;  %p3887_p6 = por %p173_p3, %p57_p0 }
  0x14   : > { %p180_p7 = scmp.lt.s32.totalorder %s3772_s28, 5  ;;  %s3774_s12 = smov [#allocation7]  }
  0x15   : > { %s4831_s9 = scalar_select %p3882_p4, 1, 0 }
  0x16   : > { %s4832_s10 = scalar_select %p3887_p6, 1, 0 }
  0x17   : > { %p3892_p8 = pnand %p2658_p5, %p180_p7  ;;  %s192_s13 = sshll.u32 %s3774_s12, 4  ;;  %s193_s13 = int_to_ptr.vmem [resolvable:$true] %s192_s13 }
  0x18   : > { %4833 = sst [smem:[#allocation23_spill]] %s4832_s10  ;;  %s3775_s15 = smov [#allocation9]  }
  0x19   : > { %s4834_s11 = scalar_select %p3892_p8, 1, 0 }
  0x1a   : > { %p3165_p9 = pneg %p3892_p8  ;;  %s208_s16 = sshll.u32 %s3775_s15, 4  ;;  %s3904_s16 = int_to_ptr.vmem [resolvable:$true] %s208_s16 }
  0x1b   : > { %s4836_s2 = sld [smem:[#allocation26_spill]] }
  0x1c   : > { %p3900_p10 = pnand %p3165_p9, %p3872_p1 }
  0x1e   : > { %p3521_p12 = pneg %p3900_p10 }
  0x21   : > { %s3519_s19 = scalar_lea.hbm %s4836_s2, 4608 }
  0x22   : > { %p3520_p11 = scmp.ne.s32.totalorder %s4836_s2, %s3519_s19  ;;  %p3526_p3 = scmp.lt.u32.totalorder %s3519_s19, %s4836_s2 }
  0x24   : > { %p3522_p13 = pnand %p3521_p12, %p3520_p11 }
  0x26   : > { %p3523_p0 = pneg %p3522_p13 }
  0x28   : > { %p3528_p5 = pnand %p3526_p3, %p3523_p0 }
  0x2a   : > { %3531 = shalt.err (!%p3528_p5)
}
  0x2b   : > { %s3532_s15 = scalar_lea.vmem %s193_s13, 4608  ;;  %p3540_p1 = scmp.lt.s32.totalorder %s193_s13, %s193_s13 }
  0x2c   : > { %p3533_p7 = scmp.ne.s32.totalorder %s193_s13, %s3532_s15  ;;  %p3541_p4 = scmp.lt.s32.totalorder %s3532_s15, %s3532_s15 }
  0x2e   : > { %p3535_p9 = pnand %p3533_p7, %p3521_p12  ;;  %p3542_p8 = por %p3541_p4, %p3540_p1 }
  0x30   : > { %p3536_p6 = pneg %p3535_p9 }
  0x32   : > { %p3543_p2 = pnand %p3542_p8, %p3536_p6 }
  0x34   : > { %3546 = shalt.err (!%p3543_p2)
}
  0x35   : > { %s3776_s17 = smov 256   ;;  %s3777_s18 = smov 16  }
  0x36   : > { %3168 = dma.hbm_to_vmem [thread:$0]  (!%p3900_p10), %s4836_s2, 4608, %s193_s13, [#allocation8], %s3776_s17, %s3776_s17, %s3777_s18  }
  0x37   : > { %s4837_s4 = sld [smem:[#allocation27_spill]] }
  0x3d   : > { %s3547_s12 = scalar_lea.hbm %s4837_s4, 4096 }
  0x3e   : > { %p3548_p11 = scmp.ne.s32.totalorder %s4837_s4, %s3547_s12  ;;  %p3554_p4 = scmp.lt.u32.totalorder %s3547_s12, %s4837_s4 }
  0x40   : > { %p3550_p1 = pnand %p3548_p11, %p3521_p12 }
  0x42   : > { %p3551_p2 = pneg %p3550_p1 }
  0x44   : > { %p3556_p6 = pnand %p3554_p4, %p3551_p2 }
  0x46   : > { %3559 = shalt.err (!%p3556_p6)
}
  0x47   : > { %s3560_s13 = scalar_lea.vmem %s3904_s16, 4096  ;;  %p3568_p3 = scmp.lt.s32.totalorder %s3904_s16, %s3904_s16 }
  0x48   : > { %p3561_p8 = scmp.ne.s32.totalorder %s3904_s16, %s3560_s13  ;;  %p3569_p5 = scmp.lt.s32.totalorder %s3560_s13, %s3560_s13 }
  0x4a   : > { %p3563_p13 = pnand %p3561_p8, %p3521_p12  ;;  %p3570_p7 = por %p3569_p5, %p3568_p3 }
  0x4c   : > { %p3564_p0 = pneg %p3563_p13 }
  0x4e   : > { %p3571_p9 = pnand %p3570_p7, %p3564_p0 }
  0x50   : > { %3574 = shalt.err (!%p3571_p9)
}
  0x51   : > { %s3778_s6 = smov 64   ;;  %s3779_s21 = smov 4  }
  0x52   : > { %3171 = dma.hbm_to_vmem [thread:$0]  (!%p3900_p10), %s4837_s4, 4096, %s3904_s16, [#allocation8], %s3778_s6, %s3778_s6, %s3779_s21  }
  0x53   : > { %s32_s18 = sadd.s32 1, %s3764_s26  ;;  %s35_s19 = sadd.s32 1, %s3768_s27 }
  0x54   : > { %p33_p12 = scmp.ge.s32.totalorder %s32_s18, 2  ;;  %s44_s20 = sadd.s32 1, %s3752_s23 }
  0x55   : > { %p51_p11 = scmp.ne.s32.totalorder %s3752_s23, %s3748_s22  ;;  %p52_p1 = scmp.eq.s32.totalorder %s3772_s28, 0 }
  0x56   : > { %s4864_s18 = smov (%p33_p12, %s32_s18), 0  ;;  %s4866_s19 = smov (!%p33_p12, %s35_s19), %s3768_s27 }
  0x57   : > { %4838 = sst [smem:[#allocation24_spill]] %s4864_s18  ;;  %s40_s29 = ssub.s32 %s3764_s26, %s4864_s18 }
  0x58   : > { %p3964_p2 = por %p52_p1, %p51_p11  ;;  %p37_p10 = scmp.ge.s32.totalorder %s4866_s19, 2 }
  0x59   : > { %p4840_p4 = scmp.ne.s32.totalorder %s4830_s8, 0  ;;  %p3182_p8 = scmp.lt.s32.totalorder %s3772_s28, 4 }
  0x5a   : > { %s225_s30 = sand.u32 1, %s3752_s23   ;;  %s4868_s19 = smov (%p37_p10, %s4866_s19), 0 }
  0x5b   : > { %p3970_p6 = por %p4840_p4, %p51_p11  ;;  %s2662_s12 = sshll.u32 %s225_s30, 7 }
  0x5c   : > { %s39_s15 = ssub.s32 %s3768_s27, %s4868_s19  ;;  %s2826_s6 = sshll.u32 %s3764_s26, 4 }
  0x5d   : > { %s4841_s16 = scalar_select %p3970_p6, 1, 0 }
  0x5e   : > { %s41_s13 = sor.u32 %s40_s29, %s39_s15  ;;  %s2665_s21 = sshll.u32 %s3768_s27, 5 }
  0x5f   : > { %4842 = sst [smem:[#allocation25_spill]] %s4841_s16  ;;  %p42_p13 = scmp.eq.s32.totalorder %s41_s13, 0 }
  0x60   : > { %s236_s10 = sadd.s32 %s2826_s6, %s2665_s21  ;;  %s229_s17 = scalar_lea.vmem [#allocation4], %s2662_s12 }
  0x61   : > { %s239_s8 = sshll.u32 %s229_s17, 4  ;;  %s2666_s4 = sshll.u32 %s236_s10, 7  ;;  %s3985_s8 = int_to_ptr.vmem [resolvable:$true] %s239_s8 }
  0x62   : > { %s3983_s2 = scalar_select %p42_p13, %s3752_s23, %s44_s20  }
  0x63   : > { %s3990_s5 = scalar_lea.hbm %s4805_s0, %s2666_s4  ;;  %p3996_p0 = pnand %p3182_p8, %p3964_p2 }
  0x64   : > { %s4000_s20 = scalar_lea.sflag [#allocation5], %s225_s30  ;;  %s3575_s12 = scalar_lea.hbm %s3990_s5, 2048 }
  0x65   : > { %p3576_p3 = scmp.ne.s32.totalorder %s3990_s5, %s3575_s12  ;;  %p3577_p5 = pneg %p3996_p0 }
  0x66   : > { %s3580_s14 = scalar_lea.hbm %s4805_s0, 8192  ;;  %p3581_p12 = scmp.lt.u32.totalorder %s3990_s5, %s4805_s0 }
  0x67   : > { %p3578_p7 = pnand %p3577_p5, %p3576_p3  ;;  %p3582_p11 = scmp.lt.u32.totalorder %s3580_s14, %s3575_s12 }
  0x68   : > { %p3584_p2 = scmp.lt.u32.totalorder %s3575_s12, %s3990_s5 }
  0x69   : > { %p3579_p9 = pneg %p3578_p7  ;;  %p3583_p1 = por %p3582_p11, %p3581_p12 }
  0x6b   : > { %p3585_p10 = por %p3584_p2, %p3583_p1 }
  0x6d   : > { %p3586_p4 = pnand %p3585_p10, %p3579_p9 }
  0x6f   : > { %3589 = shalt.err (!%p3586_p4)
}
  0x70   : > { %s3590_s30 = scalar_lea.vmem %s3985_s8, 2048  ;;  %s3780_s13 = smov [#allocation4]  }
  0x71   : > { %p3591_p8 = scmp.ne.s32.totalorder %s3985_s8, %s3590_s30  ;;  %s3595_s6 = sshll.u32 %s3780_s13, 4  ;;  %s3596_s6 = int_to_ptr.vmem [resolvable:$false] %s3595_s6 }
  0x72   : > { %s3597_s21 = scalar_lea.vmem %s3596_s6, 4096  ;;  %p3598_p7 = scmp.lt.s32.totalorder %s3985_s8, %s3596_s6 }
  0x73   : > { %p3593_p13 = pnand %p3591_p8, %p3577_p5  ;;  %p3599_p12 = scmp.lt.s32.totalorder %s3597_s21, %s3590_s30 }
  0x75   : > { %p3594_p3 = pneg %p3593_p13  ;;  %p3600_p11 = por %p3599_p12, %p3598_p7 }
  0x77   : > { %p3601_p1 = pnand %p3600_p11, %p3594_p3 }
  0x79   : > { %3604 = shalt.err (!%p3601_p1)
}
  0x7a   : > { %s3781_s10 = smov 128   ;;  %s3782_s17 = smov 8  }
  0x7b   : > { %3175 = dma.hbm_to_vmem [thread:$0]  (!%p3996_p0), %s3990_s5, 2048, %s3985_s8, %s4000_s20, %s3781_s10, %s3781_s10, %s3782_s17  }
  0x7c   : > { %p4844_p5 = scmp.ne.s32.totalorder %s4834_s11, 0 }
  0x7d   : > { %s4031_s12 = sand.u32 (!%p4844_p5), 1, %s3748_s22   ;;  %p4845_p9 = scmp.ne.s32.totalorder (!%p4844_p5), %s4831_s9, 0 }
  0x7e   : > { %251 = sbr.rel (%p4844_p5) target bundleno = 1013 (0x3f5), region = 40  ;;  %s2668_s4 = sshll.u32 (!%p4844_p5), %s4031_s12, 7 }
  0x7f   : > { %s254_s18 = scalar_lea.sflag (!%p4844_p5), [#allocation5], %s4031_s12  ;;  %s4035_s14 = scalar_lea.vmem (!%p4844_p5), [#allocation4], %s2668_s4 }
  0x85   : > { %3723 = dma.done.wait (%p4845_p9), %s254_s18, 2048  }
  0x86   : > { %3725 = vsyncadd (%p4845_p9), %s254_s18, 4294965248  ;;  %p4846_p0 = scmp.ne.s32.totalorder %s4829_s7, 0 }
  0x88   : > { %3727 = dma.done.wait (%p4846_p0), [#allocation8], 8704  }
  0x89   : > { %3729 = vsyncadd (%p4846_p0), [#allocation8], 4294958592  ;;  %s2671_s5 = sshll.u32 %s4031_s12, 6  ;;  %p3185_p2 = scmp.gt.s32.totalorder %s3756_s24, 0 }
  0x8a   : > { %s2673_s11 = sshll.u32 %s3756_s24, 3  ;;  %s2676_s8 = sshll.u32 %s3760_s25, 8 }
  0x8b   : > { %s2674_s29 = sadd.s32 4294967295, %s2673_s11  ;;  %s3783_s9 = smov [#allocation2]  }
  0x8c   : > { %s2675_s20 = sshll.u32 %s2674_s29, 4  ;;  %s313_s16 = sshll.u32 %s3783_s9, 4  ;;  %s4051_s16 = int_to_ptr.vmem [resolvable:$true] %s313_s16 }
  0x8d   : > { %s303_s15 = sadd.s32 %s2676_s8, %s2675_s20  ;;  %s3609_s4 = scalar_lea.hbm %s4806_s1, 8192 }
  0x8e   : > { %s2677_s7 = sshll.u32 %s303_s15, 4 }
  0x8f   : > { %s305_s6 = scalar_lea.hbm %s4806_s1, %s2677_s7 }
  0x90   : > { %s3605_s21 = scalar_lea.hbm %s305_s6, 256  ;;  %p3610_p13 = scmp.lt.u32.totalorder %s305_s6, %s4806_s1 }
  0x91   : > { %p3606_p10 = scmp.ne.s32.totalorder %s305_s6, %s3605_s21  ;;  %p3611_p3 = scmp.lt.u32.totalorder %s3609_s4, %s3605_s21 }
  0x92   : > { %p3613_p12 = scmp.lt.u32.totalorder %s3605_s21, %s305_s6 }
  0x93   : > { %p3607_p4 = pnand %p3606_p10, %p3185_p2  ;;  %p3612_p7 = por %p3611_p3, %p3610_p13 }
  0x95   : > { %p3608_p8 = pneg %p3607_p4  ;;  %p3614_p11 = por %p3613_p12, %p3612_p7 }
  0x97   : > { %p3615_p1 = pnand %p3614_p11, %p3608_p8 }
  0x99   : > { %3618 = shalt.err (!%p3615_p1)  }
  0x9a   : > { %s3619_s9 = scalar_lea.vmem %s4051_s16, 256  ;;  %s4822_s15 = scalar_lea.vmem %s4051_s16, 512 }
  0x9b   : > { %p3620_p5 = scmp.ne.s32.totalorder %s4051_s16, %s3619_s9  ;;  %p3626_p10 = scmp.lt.s32.totalorder %s4051_s16, %s4051_s16 }
  0x9c   : > { %p3627_p4 = scmp.lt.s32.totalorder %s4822_s15, %s3619_s9 }
  0x9d   : > { %p3621_p9 = pnand %p3620_p5, %p3185_p2 }
  0x9e   : > { %p3628_p13 = por %p3627_p4, %p3626_p10 }
  0x9f   : > { %p3622_p0 = pneg %p3621_p9 }
  0xa1   : > { %p3629_p3 = pnand %p3628_p13, %p3622_p0 }
  0xa3   : > { %3632 = shalt.err (!%p3629_p3)  }
  0xa4   : > { %3158 = dma.hbm_to_vmem [thread:$0]  (%p3185_p2), %s305_s6, 256, %s4051_s16, [#allocation3] }
  0xa5   : > { %s4082_s7 = scalar_lea.vmem [#allocation10], %s2671_s5 }
  0xa6   : > { %3731 = dma.done.wait (%p3185_p2), [#allocation3], 256 }
  0xa7   : > { %3733 = vsyncadd (%p3185_p2), [#allocation3], 4294967040  ;;  %p2678_p8 = scmp.ne.s32.totalorder %s3756_s24, 0 }
  0xa8   : > { %vm324_vm0 = vcmask (!%p2678_p8), 130048   ;;  %v3784_v0 = vmov (!%p2678_p8), 0.0  }
  0xa9   : > { %323 = sbr.rel (%p2678_p8) target bundleno = 176 (0xb0), region = 64  ;;  %325 = vst.msk [vmem:[#allocation2] sm:$0xff] (!%p2678_p8), %vm324_vm0, %v3784_v0  ;;  %326 = vst.msk [vmem:[#allocation2 + $0x8] sm:$0xff] (!%p2678_p8), %vm324_vm0, %v3784_v0 }
  0xb0 PF: > { %p3186_p7 = scmp.lt.s32.totalorder %s3756_s24, 1  ;;  %s2680_s5 = sshll.u32 %s3756_s24, 7 }
  0xb1   : > { %s2588_s30 = sadd.s32 %s2680_s5, %s2676_s8  ;;  %s3785_s13 = smov [#allocation2 + $0x10]  }
  0xb2   : > { %s347_s6 = sshll.u32 %s3785_s13, 4  ;;  %s2682_s21 = sshll.u32 %s2588_s30, 4  ;;  %s348_s6 = int_to_ptr.vmem [resolvable:$true] %s347_s6 }
  0xb3   : > { %s2590_s18 = scalar_lea.hbm %s4806_s1, %s2682_s21 }
  0xb4   : > { %s2591_s11 = scalar_lea.hbm %s2590_s18, 2048  ;;  %s3661_s29 = scalar_lea.hbm %s2590_s18, 2304 }
  0xb5   : > { %p3634_p2 = scmp.ne.s32.totalorder %s2591_s11, %s3661_s29  ;;  %p3638_p1 = scmp.lt.u32.totalorder %s2591_s11, %s4806_s1 }
  0xb6   : > { %p3639_p5 = scmp.lt.u32.totalorder %s3609_s4, %s3661_s29  ;;  %p3641_p0 = scmp.lt.u32.totalorder %s3661_s29, %s2591_s11 }
  0xb7   : > { %p3635_p12 = pnand %p3634_p2, %p3186_p7 }
  0xb8   : > { %p3640_p9 = por %p3639_p5, %p3638_p1 }
  0xb9   : > { %p3636_p11 = pneg %p3635_p12 }
  0xba   : > { %p3642_p10 = por %p3641_p0, %p3640_p9 }
  0xbc   : > { %p3643_p4 = pnand %p3642_p10, %p3636_p11 }
  0xbe   : > { %3646 = shalt.err (!%p3643_p4)  }
  0xbf   : > { %s3647_s5 = scalar_lea.vmem %s348_s6, 256  ;;  %p3654_p2 = scmp.lt.s32.totalorder %s348_s6, %s4051_s16 }
  0xc0   : > { %p3648_p13 = scmp.ne.s32.totalorder %s348_s6, %s3647_s5  ;;  %s4847_s30 = scalar_lea.vmem %s4051_s16, 512 }
  0xc1   : > { %p3655_p12 = scmp.lt.s32.totalorder %s4847_s30, %s3647_s5 }
  0xc2   : > { %p3649_p3 = pnand %p3648_p13, %p3186_p7 }
  0xc3   : > { %p3656_p6 = por %p3655_p12, %p3654_p2 }
  0xc4   : > { %p3650_p8 = pneg %p3649_p3 }
  0xc6   : > { %p3657_p1 = pnand %p3656_p6, %p3650_p8 }
  0xc8   : > { %3660 = shalt.err (!%p3657_p1)  }
  0xc9   : > { %3161 = dma.hbm_to_vmem [thread:$0]  (%p3186_p7), %s2591_s11, 256, %s348_s6, [#allocation3 + $0x1] }
  0xca   : > { %3735 = dma.done.wait (%p3186_p7), [#allocation3 + $0x1], 256 }
  0xcb   : > { %3737 = vsyncadd (%p3186_p7), [#allocation3 + $0x1], 4294967040  ;;  %p2683_p11 = scmp.ne.s32.totalorder %s3756_s24, 1 }
  0xcc   : > { %vm359_vm1 = vcmask (!%p2683_p11), 130048   ;;  %v3786_v1 = vmov (!%p2683_p11), 0.0  }
  0xcd   : > { %357 = sbr.rel (%p2683_p11) target bundleno = 212 (0xd4), region = 76  ;;  %360 = vst.msk [vmem:[#allocation2 + $0x10] sm:$0xff] (!%p2683_p11), %vm359_vm1, %v3786_v1  ;;  %361 = vst.msk [vmem:[#allocation2 + $0x18] sm:$0xff] (!%p2683_p11), %vm359_vm1, %v3786_v1 }
  0xd4 PF: > { %v4118_v2 = vld [vmem:[%s4035_s14] sm:$0xff]  ;;  %v4121_v3 = vld [vmem:[%s4035_s14 + $0x8] sm:$0xff]  ;;  %vm448_vm2 = vcmask 1046528   ;;  %v4127_v6 = vld [vmem:[%s4035_s14 + $0x10] sm:$0xff]  ;;  %s3787_s16 = smov 16   ;;  %s3788_s4 = smov 32  }
  0xd5   : > { %v453_v4 = vrot.slane %v4121_v3, 1  ;;  %v3269_v5 = vpack.i.bf16 %v4121_v3, %v4118_v2  ;;  %v4130_v7 = vld [vmem:[%s4035_s14 + $0x18] sm:$0xff]  ;;  %v452_v8 = vrot.slane %v4118_v2, 1  ;;  %v455_v12 = vrot.slane %v4127_v6, 1  ;;  %v4140_v13 = vld [vmem:[%s4035_s14 + $0x20] sm:$0xff]  ;;  %v4143_v14 = vld [vmem:[%s4035_s14 + $0x28] sm:$0xff] }
  0xd6   : > { %v456_v9 = vrot.slane %v4130_v7, 1  ;;  %v3279_v10 = vpack.i.bf16 %v4130_v7, %v4127_v6  ;;  %v4149_v17 = vld [vmem:[%s4035_s14 + $0x30] sm:$0xff]  ;;  %v4152_v18 = vld [vmem:[%s4035_s14 + $0x38] sm:$0xff]  ;;  %v458_v22 = vrot.slane %v4140_v13, 1  ;;  %v459_v23 = vrot.slane %v4143_v14, 1  ;;  %v4158_v24 = vld [vmem:[%s4035_s14 + $0x40] sm:$0xff] }
  0xd7   : > { %3270 = vrot.lane.b32.xlu0 %v3269_v5, %s3787_s16  ;;  %v482_v11 = vsel %vm448_vm2, %v453_v4, 0.0  ;;  %v454_v15 = vsel %vm448_vm2, %v452_v8, %v453_v4  ;;  %v4161_v25 = vld [vmem:[%s4035_s14 + $0x48] sm:$0xff]  ;;  %v3289_v26 = vpack.i.bf16 %v4143_v14, %v4140_v13  ;;  %v461_v27 = vrot.slane %v4149_v17, 1  ;;  %v4169_v29 = vld [vmem:[%s4035_s14 + $0x50] sm:$0xff]  ;;  %v4177_v37 = vld [vmem:[%s4035_s14 + $0x58] sm:$0xff]  ;;  %s4848_s21 = sld [smem:[#allocation28_spill]] }
  0xd8   : > { %3280 = vrot.lane.b32.xlu1 %v3279_v10, %s3787_s16  ;;  %v483_v16 = vsel %vm448_vm2, %v456_v9, 0.0  ;;  %v3274_v19 = vpack.i.bf16 %v482_v11, %v454_v15  ;;  %v457_v20 = vsel %vm448_vm2, %v455_v12, %v456_v9  ;;  %v462_v28 = vrot.slane %v4152_v18, 1  ;;  %v3369_v30 = vld [vmem:[#allocation7 + $0x64] ss:$16 sps:$4 sm:$0xff]   ;;  %v3371_v33 = vld [vmem:[#allocation7 + $0x60] ss:$16 sps:$4 sm:$0xff]  }
  0xd9   : > { %v3284_v21 = vpack.i.bf16 %v483_v16, %v457_v20  ;;  %v460_v31 = vsel %vm448_vm2, %v458_v22, %v459_v23  ;;  %v484_v32 = vsel %vm448_vm2, %v459_v23, 0.0  ;;  %776 = vmatprep.subr.bf16.mxu0 %v3369_v30  ;;  %v3372_v38 = vld [vmem:[#allocation7 + $0x6c] ss:$16 sps:$4 sm:$0xff]   ;;  %v3374_v39 = vld [vmem:[#allocation7 + $0x68] ss:$16 sps:$4 sm:$0xff]   ;;  %v464_v40 = vrot.slane %v4158_v24, 1 }
  0xda   : > { %v3294_v34 = vpack.i.bf16 %v484_v32, %v460_v31  ;;  %v463_v35 = vsel %vm448_vm2, %v461_v27, %v462_v28  ;;  %v485_v36 = vsel %vm448_vm2, %v462_v28, 0.0  ;;  %v465_v41 = vrot.slane %v4161_v25, 1  ;;  %777 = vmatpush1.bf16.msra.mxu0 %v3371_v33  ;;  %889 = vmatprep.subr.bf16.mxu1 %v3372_v38  ;;  %v3375_v44 = vld [vmem:[#allocation7 + $0x84] ss:$16 sps:$4 sm:$0xff]   ;;  %v3377_v48 = vld [vmem:[#allocation7 + $0x80] ss:$16 sps:$4 sm:$0xff]  }
  0xdb   : > { %3275 = vrot.lane.b32.xlu0 %v3274_v19, %s3788_s4  ;;  %vm399_vm3 = vcmask 1040384   ;;  %v404_v42 = vrot.slane %v4121_v3, 7  ;;  %v3299_v43 = vpack.i.bf16 %v4152_v18, %v4149_v17  ;;  %v3304_v45 = vpack.i.bf16 %v485_v36, %v463_v35  ;;  %v4188_v47 = vld [vmem:[%s4035_s14 + $0x60] sm:$0xff]  ;;  %890 = vmatpush1.bf16.msra.mxu1 %v3374_v39  ;;  %v3378_v49 = vld [vmem:[#allocation7 + $0x8c] ss:$16 sps:$4 sm:$0xff]   ;;  %v4212_v10 = vld [vmem:[%s4035_s14 + $0x70] sm:$0xff] }
  0xdc   : > { %3285 = vrot.lane.b32.xlu1 %v3284_v21, %s3788_s4  ;;  %v467_v46 = vrot.slane %v4169_v29, 1  ;;  %v466_v50 = vsel %vm448_vm2, %v464_v40, %v465_v41  ;;  %v486_v51 = vsel %vm448_vm2, %v465_v41, 0.0  ;;  %v468_v52 = vrot.slane %v4177_v37, 1  ;;  %778 = vmatprep.subr.bf16.mxu0 %v3375_v44  ;;  %v3380_v53 = vld [vmem:[#allocation7 + $0x88] ss:$16 sps:$4 sm:$0xff]   ;;  %v4246_v32 = vld [vmem:[#allocation2] sm:$0xff] }
  0xdd   : > { %v403_v54 = vrot.slane %v4118_v2, 7  ;;  %v407_v55 = vrot.slane %v4130_v7, 7  ;;  %v4196_v56 = vld [vmem:[%s4035_s14 + $0x68] sm:$0xff]  ;;  %891 = vmatprep.subr.bf16.mxu1 %v3378_v49  ;;  %v3381_v57 = vld [vmem:[#allocation7 + $0xa4] ss:$16 sps:$4 sm:$0xff]   ;;  %v406_v58 = vrot.slane %v4127_v6, 7  ;;  %v3309_v61 = vpack.i.bf16 %v4161_v25, %v4158_v24 }
  0xde   : > { %779 = vmatpush1.bf16.msra.mxu0 %v3377_v48  ;;  %v410_v59 = vrot.slane %v4143_v14, 7  ;;  %v409_v60 = vrot.slane %v4140_v13, 7  ;;  %v3383_v62 = vld [vmem:[#allocation7 + $0xa0] ss:$16 sps:$4 sm:$0xff]   ;;  %v413_v63 = vrot.slane %v4152_v18, 7  ;;  %v412_v0 = vrot.slane %v4149_v17, 7 }
  0xdf   : > { %3290 = vrot.lane.b32.xlu0 %v3289_v26, %s3787_s16  ;;  %v3314_v1 = vpack.i.bf16 %v486_v51, %v466_v50  ;;  %892 = vmatpush1.bf16.msra.mxu1 %v3380_v53  ;;  %v3384_v3 = vld [vmem:[#allocation7 + $0xac] ss:$16 sps:$4 sm:$0xff]   ;;  %v3386_v4 = vld [vmem:[#allocation7 + $0xa8] ss:$16 sps:$4 sm:$0xff]   ;;  %v469_v5 = vsel %vm448_vm2, %v467_v46, %v468_v52  ;;  %v487_v7 = vsel %vm448_vm2, %v468_v52, 0.0  ;;  %v470_v8 = vrot.slane %v4188_v47, 1 }
  0xe0   : > { %3295 = vrot.lane.b32.xlu1 %v3294_v34, %s3788_s4  ;;  %v471_v9 = vrot.slane %v4196_v56, 1  ;;  %780 = vmatprep.subr.bf16.mxu0 %v3381_v57  ;;  %v416_v11 = vrot.slane %v4161_v25, 7  ;;  %v415_v12 = vrot.slane %v4158_v24, 7  ;;  %v377_v14 = vld [vmem:[%s4035_s14 + $0x78] sm:$0xff]  ;;  %v3389_v15 = vld [vmem:[#allocation7 + $0x4] ss:$16 sps:$4 sm:$0xff]   ;;  %v3319_v16 = vpack.i.bf16 %v4177_v37, %v4169_v29 }
  0xe1   : > { %893 = vmatprep.subr.bf16.mxu1 %v3384_v3  ;;  %v4223_v18 = vsel %vm399_vm3, %v403_v54, %v404_v42  ;;  %v4228_v19 = vsel %vm399_vm3, %v406_v58, %v407_v55  ;;  %v3324_v20 = vpack.i.bf16 %v487_v7, %v469_v5  ;;  %v655_v21 = vrot.slane %v4212_v10, 1  ;;  %v3392_v22 = vld [vmem:[#allocation7 + $0xc] ss:$16 sps:$4 sm:$0xff]   ;;  %s2843_s10 = sshll.u32 %s3756_s24, 4  ;;  %s2820_s17 = sshll.u32 %s3760_s25, 5 }
  0xe2   : > { %781 = vmatpush1.bf16.msra.mxu0 %v3383_v62  ;;  %v4235_v23 = vsel %vm399_vm3, %v409_v60, %v410_v59  ;;  %v472_v25 = vsel %vm448_vm2, %v470_v8, %v471_v9  ;;  %v488_v26 = vsel %vm448_vm2, %v471_v9, 0.0  ;;  %v656_v27 = vrot.slane %v377_v14, 1  ;;  %v379_v28 = vld [vmem:[#allocation2 + $0x8] sm:$0xff]  ;;  %v4296_v62 = vld [vmem:[#allocation2 + $0x10] sm:$0xff]  ;;  %s4849_s18 = sld [smem:[#allocation25_spill]]  ;;  %s2520_s11 = sadd.s32 %s2843_s10, %s2820_s17 }
  0xe3   : > { %3300 = vrot.lane.b32.xlu0 %v3299_v43, %s3787_s16  ;;  %894 = vmatpush1.bf16.msra.mxu1 %v3386_v4  ;;  %v3789_v30 = vmov 0   ;;  %v4244_v31 = vsel %vm399_vm3, %v412_v0, %v413_v63  ;;  %v3329_v33 = vpack.i.bf16 %v4196_v56, %v4188_v47  ;;  %v4254_v34 = vsel %vm399_vm3, %v415_v12, %v416_v11  ;;  %v4298_v63 = vld [vmem:[#allocation2 + $0x18] sm:$0xff]  ;;  %s2821_s29 = sshll.u32 %s2520_s11, 6  ;;  %s2523_s20 = sshll.u32 %s4082_s7, 4  ;;  %s4750_s20 = int_to_ptr.vmem [resolvable:$true] %s2523_s20 }
  0xe4   : > { %3305 = vrot.lane.b32.xlu1 %v3304_v45, %s3788_s4  ;;  %808 = vmatprep.mubr.bf16.mxu0 %v3789_v30  ;;  %v3334_v35 = vpack.i.bf16 %v488_v26, %v472_v25  ;;  %v450_v36 = vrot.slane %v379_v28, 1  ;;  %v657_v38 = vsel %vm448_vm2, %v655_v21, %v656_v27  ;;  %v659_v39 = vsel %vm448_vm2, %v656_v27, 0.0  ;;  %s4850_s9 = sld [smem:[#allocation29_spill]]  ;;  %s2507_s5 = scalar_lea.sflag [#allocation6], %s4031_s12 }
  0xe5   : > { %921 = vmatprep.mubr.bf16.mxu1 %v3789_v30  ;;  %1065 = vmatprep.subr.bf16.mxu0 %v3389_v15  ;;  %v449_v40 = vrot.slane %v4246_v32, 1  ;;  %v419_v41 = vrot.slane %v4177_v37, 7  ;;  %v418_v42 = vrot.slane %v4169_v29, 7  ;;  %v3339_v43 = vpack.i.bf16 %v377_v14, %v4212_v10  ;;  %s3662_s30 = scalar_lea.vmem %s4750_s20, 1024 }
  0xe6   : > { %1178 = vmatprep.subr.bf16.mxu1 %v3392_v22  ;;  %v3344_v44 = vpack.i.bf16 %v659_v39, %v657_v38  ;;  %v481_v45 = vsel %vm448_vm2, %v450_v36, 0.0  ;;  %v422_v48 = vrot.slane %v4196_v56, 7  ;;  %v421_v49 = vrot.slane %v4188_v47, 7  ;;  %v3387_v39 = vld [vmem:[#allocation7] ss:$16 sps:$4 sm:$0xff]   ;;  %p3663_p6 = scmp.ne.s32.totalorder %s4750_s20, %s3662_s30 }
  0xe7   : > { %3310 = vrot.lane.b32.xlu0 %v3309_v61, %s3787_s16  ;;  %v451_v46 = vsel %vm448_vm2, %v449_v40, %v450_v36  ;;  %v3349_v37 = vpack.i.bf16 %v379_v28, %v4246_v32  ;;  %v4274_v50 = vsel %vm399_vm3, %v418_v42, %v419_v41  ;;  %v650_v53 = vrot.slane %v377_v14, 7  ;;  %v3390_v40 = vld [vmem:[#allocation7 + $0x8] ss:$16 sps:$4 sm:$0xff]  }
  0xe8   : > { %3315 = vrot.lane.b32.xlu1 %v3314_v1, %s3788_s4  ;;  %v3354_v51 = vpack.i.bf16 %v481_v45, %v451_v46  ;;  %v4282_v52 = vsel %vm399_vm3, %v421_v49, %v422_v48  ;;  %v649_v55 = vrot.slane %v4212_v10, 7  ;;  %v401_v56 = vrot.slane %v379_v28, 7  ;;  %p4851_p7 = scmp.ne.s32.totalorder %s4849_s18, 0 }
  0xe9   : > { %v400_v57 = vrot.slane %v4246_v32, 7  ;;  %v3359_v1 = vpack.i.bf16 %v4298_v63, %v4296_v62  ;;  %v1299_v3 = vrot.slane %v4296_v62, 1  ;;  %v1300_v4 = vrot.slane %v4298_v63, 1 }
  0xea   : > { %v4289_v59 = vsel %vm399_vm3, %v649_v55, %v650_v53  ;;  %v442_v11 = vsel %vm399_vm3, 0.0, %v406_v58  ;;  %v441_v22 = vsel %vm399_vm3, 0.0, %v403_v54  ;;  %vm593_vm4 = vcmask 130048   ;;  %v3398_v53 = vld [vmem:[#allocation7 + $0x2c] ss:$16 sps:$4 sm:$0xff]   ;;  %s4748_s8 = scalar_lea.hbm %s4850_s9, %s2821_s29  ;;  %p3664_p5 = pnand %p3663_p6, %p4851_p7 }
  0xeb   : > { %3320 = vrot.lane.b32.xlu0 %v3319_v16, %s3787_s16  ;;  %v4294_v61 = vsel %vm399_vm3, %v400_v57, %v401_v56  ;;  %v1301_v5 = vsel %vm448_vm2, %v1299_v3, %v1300_v4  ;;  %v1303_v7 = vsel %vm448_vm2, %v1300_v4, 0.0  ;;  %vm610_vm5 = vcmask 261120   ;;  %v3393_v3 = vld [vmem:[#allocation7 + $0x20] ss:$16 sps:$4 sm:$0xff]   ;;  %v3396_v4 = vld [vmem:[#allocation7 + $0x28] ss:$16 sps:$4 sm:$0xff]  }
  0xec   : > { %3325 = vrot.lane.b32.xlu1 %v3324_v20, %s3788_s4  ;;  %v3364_v8 = vpack.i.bf16 %v1303_v7, %v1301_v5  ;;  %vm751_vm6 = vcmask 392192   ;;  %v440_v10 = vsel %vm399_vm3, 0.0, %v400_v57  ;;  %p3665_p9 = pneg %p3664_p5 }
  0xef   : > { %3330 = vrot.lane.b32.xlu0 %v3329_v33, %s3787_s16 }
  0xf0   : > { %3335 = vrot.lane.b32.xlu1 %v3334_v35, %s3788_s4 }
  0xf3   : > { %3340 = vrot.lane.b32.xlu0 %v3339_v43, %s3787_s16 }
  0xf4   : > { %3345 = vrot.lane.b32.xlu1 %v3344_v44, %s3788_s4  ;;  %v443_v44 = vsel %vm399_vm3, 0.0, %v409_v60 }
  0xf7   : > { %3350 = vrot.lane.b32.xlu0 %v3349_v37, %s3787_s16 }
  0xf8   : > { %3355 = vrot.lane.b32.xlu1 %v3354_v51, %s3788_s4  ;;  %v3395_v51 = vld [vmem:[#allocation7 + $0x24] ss:$16 sps:$4 sm:$0xff]  }
  0xfb   : > { %3360 = vrot.lane.b32.xlu0 %v3359_v1, %s3787_s16  ;;  %s3790_s16 = smov [#allocation10]  }
  0xfc   : > { %3365 = vrot.lane.b32.xlu1 %v3364_v8, %s3788_s4  ;;  %v444_v8 = vsel %vm399_vm3, 0.0, %v412_v0  ;;  %s3666_s4 = sshll.u32 %s3790_s16, 4  ;;  %s3667_s4 = int_to_ptr.vmem [resolvable:$false] %s3666_s4 }
  0xfd   : > { %s3668_s14 = scalar_lea.vmem %s3667_s4, 2048  ;;  %p3669_p0 = scmp.lt.s32.totalorder %s4750_s20, %s3667_s4 }
  0xfe   : > { %p3670_p10 = scmp.lt.s32.totalorder %s3668_s14, %s3662_s30 }
 0x100   : > { %p3671_p4 = por %p3670_p10, %p3669_p0 }
 0x102   : > { %p3672_p13 = pnand %p3671_p4, %p3665_p9 }
 0x149   : > { %v3271_v9 = vpop.permute.xlu0 %3270 }
 0x14a   : > { %v3281_v14 = vpop.permute.xlu1 %3280  ;;  %v3273_v15 = vunpack.i.h.bf16 %v3271_v9  ;;  %v3272_v16 = vunpack.i.l.bf16 %v3271_v9 }
 0x14b   : > { %v3283_v20 = vunpack.i.h.bf16 %v3281_v14  ;;  %v3282_v21 = vunpack.i.l.bf16 %v3281_v14  ;;  %v3404_v14 = vld [vmem:[#allocation7 + $0x4c] ss:$16 sps:$4 sm:$0xff]  }
 0x14c   : > { %v596_v33 = vsel %vm593_vm4, %v441_v22, %v3272_v16  ;;  %v597_v35 = vsel %vm593_vm4, %v4223_v18, %v3273_v15 }
 0x14d   : > { %v3276_v25 = vpop.permute.xlu0 %3275  ;;  %v598_v28 = vsel %vm593_vm4, %v442_v11, %v3282_v21  ;;  %v599_v6 = vsel %vm593_vm4, %v4228_v19, %v3283_v20  ;;  %v3401_v11 = vld [vmem:[#allocation7 + $0x44] ss:$16 sps:$4 sm:$0xff]  }
 0x14e   : > { %v3278_v26 = vunpack.i.h.bf16 %v3276_v25  ;;  %v3277_v27 = vunpack.i.l.bf16 %v3276_v25  ;;  %v3286_v58 = vpop.permute.xlu1 %3285 }
 0x14f   : > { %v3288_v36 = vunpack.i.h.bf16 %v3286_v58  ;;  %v3287_v2 = vunpack.i.l.bf16 %v3286_v58  ;;  %v3402_v58 = vld [vmem:[#allocation7 + $0x48] ss:$16 sps:$4 sm:$0xff]  }
 0x150   : > { %v613_v54 = vsel %vm610_vm5, %v596_v33, %v3277_v27  ;;  %v614_v38 = vsel %vm610_vm5, %v597_v35, %v3278_v26  ;;  %v445_v27 = vsel %vm399_vm3, 0.0, %v415_v12 }
 0x151   : > { %v4322_v41 = vpack.c.bf16 %v614_v38, %v613_v54  ;;  %v615_v43 = vsel %vm610_vm5, %v598_v28, %v3287_v2  ;;  %v616_v19 = vsel %vm610_vm5, %v599_v6, %v3288_v36  ;;  %v3291_v18 = vpop.permute.xlu0 %3290  ;;  %v3399_v6 = vld [vmem:[#allocation7 + $0x40] ss:$16 sps:$4 sm:$0xff]   ;;  %v3407_v2 = vld [vmem:[#allocation7 + $0xc4] ss:$16 sps:$4 sm:$0xff]   ;;  %v3410_v54 = vld [vmem:[#allocation7 + $0xcc] ss:$16 sps:$4 sm:$0xff]  }
 0x152   : > { %v4329_v45 = vpack.c.bf16 %v616_v19, %v615_v43  ;;  %v3293_v46 = vunpack.i.h.bf16 %v3291_v18  ;;  %v3292_v48 = vunpack.i.l.bf16 %v3291_v18  ;;  %v3296_v37 = vpop.permute.xlu1 %3295  ;;  %v446_v19 = vsel %vm399_vm3, 0.0, %v418_v42 }
 0x153   : > { %2696 = vmatmul.mubr.msk.bf16.vlgmr.msra.gmra.mrb[0].mxu0 %vm751_vm6, %v4322_v41  ;;  %2704 = vmatmul.mubr.msk.bf16.vlgmr.msra.gmra.mrb[0].mxu1 %vm751_vm6, %v4322_v41  ;;  %v3298_v56 = vunpack.i.h.bf16 %v3296_v37  ;;  %v3297_v1 = vunpack.i.l.bf16 %v3296_v37 }
 0x154   : > { %1066 = vmatpush1.bf16.msra.mxu0 %v3387_v39  ;;  %1179 = vmatpush1.bf16.msra.mxu1 %v3390_v40  ;;  %v601_v13 = vsel %vm593_vm4, %v4235_v23, %v3293_v46  ;;  %v600_v60 = vsel %vm593_vm4, %v443_v44, %v3292_v48 }
 0x155   : > { %818 = vmatprep.mubr.bf16.mxu0 %v3789_v30  ;;  %931 = vmatprep.mubr.bf16.mxu1 %v3789_v30  ;;  %v617_v5 = vsel %vm610_vm5, %v600_v60, %v3297_v1  ;;  %v618_v7 = vsel %vm610_vm5, %v601_v13, %v3298_v56  ;;  %v3301_v9 = vpop.permute.xlu0 %3300  ;;  %v447_v1 = vsel %vm399_vm3, 0.0, %v421_v49 }
 0x156   : > { %v4345_v23 = vpack.c.bf16 %v618_v7, %v617_v5  ;;  %v3303_v15 = vunpack.i.h.bf16 %v3301_v9  ;;  %v3302_v16 = vunpack.i.l.bf16 %v3301_v9  ;;  %v3306_v20 = vpop.permute.xlu1 %3305  ;;  %1067 = vmatprep.subr.bf16.mxu0 %v3395_v51  ;;  %1180 = vmatprep.subr.bf16.mxu1 %v3398_v53 }
 0x157   : > { %v3308_v21 = vunpack.i.h.bf16 %v3306_v20  ;;  %v3307_v22 = vunpack.i.l.bf16 %v3306_v20 }
 0x158   : > { %v603_v25 = vsel %vm593_vm4, %v4244_v31, %v3303_v15  ;;  %v602_v26 = vsel %vm593_vm4, %v444_v8, %v3302_v16  ;;  %1068 = vmatpush1.bf16.msra.mxu0 %v3393_v3  ;;  %1181 = vmatpush1.bf16.msra.mxu1 %v3396_v4 }
 0x159   : > { %v619_v17 = vsel %vm610_vm5, %v602_v26, %v3307_v22  ;;  %v620_v0 = vsel %vm610_vm5, %v603_v25, %v3308_v21  ;;  %v3311_v28 = vpop.permute.xlu0 %3310  ;;  %1069 = vmatprep.subr.bf16.mxu0 %v3401_v11  ;;  %1182 = vmatprep.subr.bf16.mxu1 %v3404_v14  ;;  %v654_v11 = vsel %vm399_vm3, 0.0, %v649_v55 }
 0x15a   : > { %v4355_v33 = vpack.c.bf16 %v620_v0, %v619_v17  ;;  %v3313_v31 = vunpack.i.h.bf16 %v3311_v28  ;;  %v3312_v35 = vunpack.i.l.bf16 %v3311_v28  ;;  %v3316_v36 = vpop.permute.xlu1 %3315 }
 0x15b   : > { %2697 = vmatmul.mubr.msk.bf16.gmra.mrb[4].mxu0 %vm751_vm6, %v4329_v45  ;;  %2705 = vmatmul.mubr.msk.bf16.gmra.mrb[4].mxu1 %vm751_vm6, %v4329_v45  ;;  %v3318_v24 = vunpack.i.h.bf16 %v3316_v36  ;;  %v3317_v12 = vunpack.i.l.bf16 %v3316_v36 }
 0x15c   : > { %828 = vmatprep.mubr.bf16.mxu0 %v3789_v30  ;;  %941 = vmatprep.mubr.bf16.mxu1 %v3789_v30  ;;  %v605_v38 = vsel %vm593_vm4, %v4254_v34, %v3313_v31  ;;  %v604_v39 = vsel %vm593_vm4, %v445_v27, %v3312_v35 }
 0x15d   : > { %v621_v40 = vsel %vm610_vm5, %v604_v39, %v3317_v12  ;;  %v622_v43 = vsel %vm610_vm5, %v605_v38, %v3318_v24  ;;  %v3321_v44 = vpop.permute.xlu0 %3320  ;;  %1070 = vmatpush1.bf16.msra.mxu0 %v3399_v6  ;;  %1183 = vmatpush1.bf16.msra.mxu1 %v3402_v58 }
 0x15e   : > { %v4371_v18 = vpack.c.bf16 %v622_v43, %v621_v40  ;;  %v3323_v46 = vunpack.i.h.bf16 %v3321_v44  ;;  %v3322_v48 = vunpack.i.l.bf16 %v3321_v44  ;;  %v3326_v37 = vpop.permute.xlu1 %3325  ;;  %1398 = vmatprep.subr.bf16.mxu0 %v3407_v2  ;;  %1511 = vmatprep.subr.bf16.mxu1 %v3410_v54  ;;  %v1293_v54 = vrot.slane %v4296_v62, 7 }
 0x15f   : > { %v3328_v34 = vunpack.i.h.bf16 %v3326_v37  ;;  %v3327_v51 = vunpack.i.l.bf16 %v3326_v37 }
 0x160   : > { %v607_v53 = vsel %vm593_vm4, %v4274_v50, %v3323_v46  ;;  %v606_v56 = vsel %vm593_vm4, %v446_v19, %v3322_v48  ;;  %v1298_v12 = vsel %vm399_vm3, 0.0, %v1293_v54 }
 0x161   : > { %v623_v29 = vsel %vm610_vm5, %v606_v56, %v3327_v51  ;;  %v624_v42 = vsel %vm610_vm5, %v607_v53, %v3328_v34  ;;  %v3331_v13 = vpop.permute.xlu0 %3330  ;;  %v3405_v34 = vld [vmem:[#allocation7 + $0xc0] ss:$16 sps:$4 sm:$0xff]   ;;  %v3408_v51 = vld [vmem:[#allocation7 + $0xc8] ss:$16 sps:$4 sm:$0xff]   ;;  %v3413_v53 = vld [vmem:[#allocation7 + $0xe4] ss:$16 sps:$4 sm:$0xff]  }
 0x162   : > { %v4381_v60 = vpack.c.bf16 %v624_v42, %v623_v29  ;;  %v3333_v3 = vunpack.i.h.bf16 %v3331_v13  ;;  %v3332_v4 = vunpack.i.l.bf16 %v3331_v13  ;;  %v3336_v5 = vpop.permute.xlu1 %3335  ;;  %v3416_v56 = vld [vmem:[#allocation7 + $0xec] ss:$16 sps:$4 sm:$0xff]   ;;  %v3411_v29 = vld [vmem:[#allocation7 + $0xe0] ss:$16 sps:$4 sm:$0xff]   ;;  %v3414_v42 = vld [vmem:[#allocation7 + $0xe8] ss:$16 sps:$4 sm:$0xff]  }
 0x163   : > { %2698 = vmatmul.mubr.msk.bf16.gmra.mrb[8].mxu0 %vm751_vm6, %v4345_v23  ;;  %2706 = vmatmul.mubr.msk.bf16.gmra.mrb[8].mxu1 %vm751_vm6, %v4345_v23  ;;  %v3338_v50 = vunpack.i.h.bf16 %v3336_v5  ;;  %v3337_v7 = vunpack.i.l.bf16 %v3336_v5  ;;  %v3422_v13 = vld [vmem:[#allocation7 + $0x10c] ss:$16 sps:$4 sm:$0xff]   ;;  %v3423_v5 = vld [vmem:[#allocation9 + $0x40] sm:$0xff]  }
 0x164   : > { %838 = vmatprep.mubr.bf16.mxu0 %v3789_v30  ;;  %951 = vmatprep.mubr.bf16.mxu1 %v3789_v30  ;;  %v609_v47 = vsel %vm593_vm4, %v4282_v52, %v3333_v3  ;;  %v608_v49 = vsel %vm593_vm4, %v447_v1, %v3332_v4  ;;  %v3419_v1 = vld [vmem:[#allocation7 + $0x104] ss:$16 sps:$4 sm:$0xff]   ;;  %v3417_v3 = vld [vmem:[#allocation7 + $0x100] ss:$16 sps:$4 sm:$0xff]   ;;  %v3420_v4 = vld [vmem:[#allocation7 + $0x108] ss:$16 sps:$4 sm:$0xff]  }
 0x165   : > { %v625_v8 = vsel %vm610_vm5, %v608_v49, %v3337_v7  ;;  %v626_v9 = vsel %vm610_vm5, %v609_v47, %v3338_v50  ;;  %v3341_v14 = vpop.permute.xlu0 %3340  ;;  %v3425_v50 = vld [vmem:[#allocation9 + $0xc0] sm:$0xff]   ;;  %v3427_v47 = vld [vmem:[#allocation9 + $0x48] sm:$0xff]  }
 0x166   : > { %v4397_v15 = vpack.c.bf16 %v626_v9, %v625_v8  ;;  %v3343_v16 = vunpack.i.h.bf16 %v3341_v14  ;;  %v3342_v20 = vunpack.i.l.bf16 %v3341_v14  ;;  %v3346_v21 = vpop.permute.xlu1 %3345  ;;  %v3426_v7 = vld [vmem:[#allocation9 + $0x80] sm:$0xff]   ;;  %v3429_v49 = vld [vmem:[#allocation9 + $0xc8] sm:$0xff]   ;;  %v3433_v14 = vld [vmem:[#allocation9 + $0xd0] sm:$0xff]  }
 0x167   : > { %v3348_v22 = vunpack.i.h.bf16 %v3346_v21  ;;  %v3347_v25 = vunpack.i.l.bf16 %v3346_v21  ;;  %v3428_v8 = vld [vmem:[#allocation9 + $0x8] sm:$0xff]   ;;  %v3435_v21 = vld [vmem:[#allocation9 + $0x58] sm:$0xff]  }
 0x168   : > { %v674_v52 = vsel %vm593_vm4, %v4289_v59, %v3343_v16  ;;  %v673_v26 = vsel %vm593_vm4, %v654_v11, %v3342_v20  ;;  %v3430_v9 = vld [vmem:[#allocation9 + $0x88] sm:$0xff]   ;;  %v3431_v11 = vld [vmem:[#allocation9 + $0x50] sm:$0xff]  }
 0x169   : > { %v675_v17 = vsel %vm610_vm5, %v673_v26, %v3347_v25  ;;  %v676_v0 = vsel %vm610_vm5, %v674_v52, %v3348_v22  ;;  %v3351_v55 = vpop.permute.xlu0 %3350  ;;  %v3432_v16 = vld [vmem:[#allocation9 + $0x10] sm:$0xff]   ;;  %v3436_v22 = vld [vmem:[#allocation9 + $0x18] sm:$0xff]   ;;  %v3439_v52 = vld [vmem:[#allocation9 + $0x60] sm:$0xff]  }
 0x16a   : > { %v4407_v27 = vpack.c.bf16 %v676_v0, %v675_v17  ;;  %v3353_v28 = vunpack.i.h.bf16 %v3351_v55  ;;  %v3352_v6 = vunpack.i.l.bf16 %v3351_v55  ;;  %v3356_v58 = vpop.permute.xlu1 %3355  ;;  %v3434_v20 = vld [vmem:[#allocation9 + $0x90] sm:$0xff]   ;;  %v3438_v25 = vld [vmem:[#allocation9 + $0x98] sm:$0xff]   ;;  %v3441_v26 = vld [vmem:[#allocation9 + $0xe0] sm:$0xff]  }
 0x16b   : > { %2699 = vmatmul.mubr.msk.bf16.gmra.mrb[12].mxu0 %vm751_vm6, %v4355_v33  ;;  %2707 = vmatmul.mubr.msk.bf16.gmra.mrb[12].mxu1 %vm751_vm6, %v4355_v33  ;;  %v3358_v59 = vunpack.i.h.bf16 %v3356_v58  ;;  %v3357_v31 = vunpack.i.l.bf16 %v3356_v58  ;;  %v3440_v17 = vld [vmem:[#allocation9 + $0x20] sm:$0xff]   ;;  %v3444_v55 = vld [vmem:[#allocation9 + $0x28] sm:$0xff]   ;;  %v3449_v58 = vld [vmem:[#allocation9 + $0xf0] sm:$0xff]  }
 0x16c   : > { %848 = vmatprep.mubr.bf16.mxu0 %v3789_v30  ;;  %961 = vmatprep.mubr.bf16.mxu1 %v3789_v30  ;;  %v595_v32 = vsel %vm593_vm4, %v4294_v61, %v3353_v28  ;;  %v594_v57 = vsel %vm593_vm4, %v440_v10, %v3352_v6  ;;  %v1294_v61 = vrot.slane %v4298_v63, 7  ;;  %v3442_v0 = vld [vmem:[#allocation9 + $0xa0] sm:$0xff]   ;;  %v3443_v10 = vld [vmem:[#allocation9 + $0x68] sm:$0xff]   ;;  %v3447_v6 = vld [vmem:[#allocation9 + $0x70] sm:$0xff]  }
 0x16d   : > { %v611_v35 = vsel %vm610_vm5, %v594_v57, %v3357_v31  ;;  %v612_v36 = vsel %vm610_vm5, %v595_v32, %v3358_v59  ;;  %v3361_v38 = vpop.permute.xlu0 %3360  ;;  %v3446_v28 = vld [vmem:[#allocation9 + $0xa8] sm:$0xff]   ;;  %v3448_v59 = vld [vmem:[#allocation9 + $0x30] sm:$0xff]   ;;  %v1690_v32 = vlaneseq }
 0x16e   : > { %v627_v2 = vpack.c.bf16 %v612_v36, %v611_v35  ;;  %v1295_v24 = vsel %vm399_vm3, %v1293_v54, %v1294_v61  ;;  %v3363_v39 = vunpack.i.h.bf16 %v3361_v38  ;;  %v3362_v40 = vunpack.i.l.bf16 %v3361_v38  ;;  %v3366_v63 = vpop.permute.xlu1 %3365  ;;  %v3450_v31 = vld [vmem:[#allocation9 + $0xb0] sm:$0xff]  }
 0x16f   : > { %v3368_v43 = vunpack.i.h.bf16 %v3366_v63  ;;  %v3367_v62 = vunpack.i.l.bf16 %v3366_v63 }
 0x170   : > { %v1318_v19 = vsel %vm593_vm4, %v1295_v24, %v3363_v39  ;;  %v1317_v44 = vsel %vm593_vm4, %v1298_v12, %v3362_v40 }
 0x171   : > { %v1319_v46 = vsel %vm610_vm5, %v1317_v44, %v3367_v62  ;;  %v1320_v48 = vsel %vm610_vm5, %v1318_v19, %v3368_v43 }
 0x172   : > { %v4446_v37 = vpack.c.bf16 %v1320_v48, %v1319_v46 }
 0x173   : > { %2700 = vmatmul.mubr.msk.bf16.gmra.mrb[16].mxu0 %vm751_vm6, %v4371_v18  ;;  %2708 = vmatmul.mubr.msk.bf16.gmra.mrb[16].mxu1 %vm751_vm6, %v4371_v18 }
 0x174   : > { %858 = vmatprep.mubr.bf16.mxu0 %v3789_v30  ;;  %971 = vmatprep.mubr.bf16.mxu1 %v3789_v30 }
 0x17b   : > { %2701 = vmatmul.mubr.msk.bf16.gmra.mrb[20].mxu0 %vm751_vm6, %v4381_v60  ;;  %2709 = vmatmul.mubr.msk.bf16.gmra.mrb[20].mxu1 %vm751_vm6, %v4381_v60 }
 0x17c   : > { %868 = vmatprep.mubr.bf16.mxu0 %v3789_v30  ;;  %981 = vmatprep.mubr.bf16.mxu1 %v3789_v30 }
 0x183   : > { %2702 = vmatmul.mubr.msk.bf16.gmra.mrb[24].mxu0 %vm751_vm6, %v4397_v15  ;;  %2710 = vmatmul.mubr.msk.bf16.gmra.mrb[24].mxu1 %vm751_vm6, %v4397_v15 }
 0x184   : > { %878 = vmatprep.mubr.bf16.mxu0 %v3789_v30  ;;  %991 = vmatprep.mubr.bf16.mxu1 %v3789_v30 }
 0x18b   : > { %2703 = vmatmul.mubr.msk.bf16.gmra.mrb[28].mxu0 %vm751_vm6, %v4407_v27  ;;  %2711 = vmatmul.mubr.msk.bf16.gmra.mrb[28].mxu1 %vm751_vm6, %v4407_v27 }
 0x18c   : > { %1097 = vmatprep.mubr.bf16.mxu0 %v3789_v30  ;;  %1210 = vmatprep.mubr.bf16.mxu1 %v3789_v30 }
 0x193   : > { %2724 = vmatmul.mubr.msk.bf16.vlgmr.msra.gmra.mrb[0].mxu0 %vm751_vm6, %v627_v2  ;;  %2732 = vmatmul.mubr.msk.bf16.vlgmr.msra.gmra.mrb[0].mxu1 %vm751_vm6, %v627_v2 }
 0x194   : > { %1399 = vmatpush1.bf16.msra.mxu0 %v3405_v34  ;;  %1512 = vmatpush1.bf16.msra.mxu1 %v3408_v51 }
 0x195   : > { %1107 = vmatprep.mubr.bf16.mxu0 %v3789_v30  ;;  %1220 = vmatprep.mubr.bf16.mxu1 %v3789_v30 }
 0x196   : > { %1400 = vmatprep.subr.bf16.mxu0 %v3413_v53  ;;  %1513 = vmatprep.subr.bf16.mxu1 %v3416_v56 }
 0x198   : > { %1401 = vmatpush1.bf16.msra.mxu0 %v3411_v29  ;;  %1514 = vmatpush1.bf16.msra.mxu1 %v3414_v42 }
 0x199   : > { %1402 = vmatprep.subr.bf16.mxu0 %v3419_v1  ;;  %1515 = vmatprep.subr.bf16.mxu1 %v3422_v13 }
 0x19b   : > { %2725 = vmatmul.mubr.msk.bf16.gmra.mrb[4].mxu0 %vm751_vm6, %v4322_v41  ;;  %2733 = vmatmul.mubr.msk.bf16.gmra.mrb[4].mxu1 %vm751_vm6, %v4322_v41  ;;  %v3424_v41 = vld [vmem:[#allocation9] sm:$0xff]  }
 0x19c   : > { %1117 = vmatprep.mubr.bf16.mxu0 %v3789_v30  ;;  %1230 = vmatprep.mubr.bf16.mxu1 %v3789_v30 }
 0x19d   : > { %1403 = vmatpush1.bf16.msra.mxu0 %v3417_v3  ;;  %1516 = vmatpush1.bf16.msra.mxu1 %v3420_v4 }
 0x19e   : > { %2891 = vmatprep.subr.bf16.mxu0 %v3423_v5  ;;  %2955 = vmatprep.subr.bf16.mxu1 %v3425_v50 }
 0x1a3   : > { %2726 = vmatmul.mubr.msk.bf16.gmra.mrb[8].mxu0 %vm751_vm6, %v4329_v45  ;;  %2734 = vmatmul.mubr.msk.bf16.gmra.mrb[8].mxu1 %vm751_vm6, %v4329_v45 }
 0x1a4   : > { %1127 = vmatprep.mubr.bf16.mxu0 %v3789_v30  ;;  %1240 = vmatprep.mubr.bf16.mxu1 %v3789_v30 }
 0x1ab   : > { %2727 = vmatmul.mubr.msk.bf16.gmra.mrb[12].mxu0 %vm751_vm6, %v4345_v23  ;;  %2735 = vmatmul.mubr.msk.bf16.gmra.mrb[12].mxu1 %vm751_vm6, %v4345_v23 }
 0x1ac   : > { %1137 = vmatprep.mubr.bf16.mxu0 %v3789_v30  ;;  %1250 = vmatprep.mubr.bf16.mxu1 %v3789_v30 }
 0x1b3   : > { %2728 = vmatmul.mubr.msk.bf16.gmra.mrb[16].mxu0 %vm751_vm6, %v4355_v33  ;;  %2736 = vmatmul.mubr.msk.bf16.gmra.mrb[16].mxu1 %vm751_vm6, %v4355_v33 }
 0x1b4   : > { %1147 = vmatprep.mubr.bf16.mxu0 %v3789_v30  ;;  %1260 = vmatprep.mubr.bf16.mxu1 %v3789_v30 }
 0x1bb   : > { %2729 = vmatmul.mubr.msk.bf16.gmra.mrb[20].mxu0 %vm751_vm6, %v4371_v18  ;;  %2737 = vmatmul.mubr.msk.bf16.gmra.mrb[20].mxu1 %vm751_vm6, %v4371_v18 }
 0x1bc   : > { %1157 = vmatprep.mubr.bf16.mxu0 %v3789_v30  ;;  %1270 = vmatprep.mubr.bf16.mxu1 %v3789_v30 }
 0x1c3   : > { %2730 = vmatmul.mubr.msk.bf16.gmra.mrb[24].mxu0 %vm751_vm6, %v4381_v60  ;;  %2738 = vmatmul.mubr.msk.bf16.gmra.mrb[24].mxu1 %vm751_vm6, %v4381_v60 }
 0x1c4   : > { %1167 = vmatprep.mubr.bf16.mxu0 %v3789_v30  ;;  %1280 = vmatprep.mubr.bf16.mxu1 %v3789_v30 }
 0x1cb   : > { %2731 = vmatmul.mubr.msk.bf16.gmra.mrb[28].mxu0 %vm751_vm6, %v4397_v15  ;;  %2739 = vmatmul.mubr.msk.bf16.gmra.mrb[28].mxu1 %vm751_vm6, %v4397_v15 }
 0x1cc   : > { %1430 = vmatprep.mubr.bf16.mxu0 %v3789_v30  ;;  %1543 = vmatprep.mubr.bf16.mxu1 %v3789_v30 }
 0x1d3   : > { %2752 = vmatmul.mubr.msk.bf16.vlgmr.msra.gmra.mrb[0].mxu0 %vm751_vm6, %v4329_v45  ;;  %2760 = vmatmul.mubr.msk.bf16.vlgmr.msra.gmra.mrb[0].mxu1 %vm751_vm6, %v4329_v45  ;;  %v3437_v45 = vld [vmem:[#allocation9 + $0xd8] sm:$0xff]  }
 0x1d4   : > { %1440 = vmatprep.mubr.bf16.mxu0 %v3789_v30  ;;  %1553 = vmatprep.mubr.bf16.mxu1 %v3789_v30 }
 0x1d5   : > { %2892 = vmatpush3.bf16.msra.mxu0 %v3424_v41  ;;  %2956 = vmatpush3.bf16.msra.mxu1 %v3426_v7 }
 0x1d6   : > { %2893 = vmatprep.subr.bf16.mxu0 %v3427_v47  ;;  %2957 = vmatprep.subr.bf16.mxu1 %v3429_v49 }
 0x1d9   : > { %2894 = vmatpush3.bf16.msra.mxu0 %v3428_v8  ;;  %2958 = vmatpush3.bf16.msra.mxu1 %v3430_v9 }
 0x1da   : > { %2895 = vmatprep.subr.bf16.mxu0 %v3431_v11  ;;  %2959 = vmatprep.subr.bf16.mxu1 %v3433_v14 }
 0x1db   : > { %2753 = vmatmul.mubr.msk.bf16.gmra.mrb[4].mxu0 %vm751_vm6, %v4345_v23  ;;  %2761 = vmatmul.mubr.msk.bf16.gmra.mrb[4].mxu1 %vm751_vm6, %v4345_v23  ;;  %v3445_v23 = vld [vmem:[#allocation9 + $0xe8] sm:$0xff]  }
 0x1dc   : > { %1450 = vmatprep.mubr.bf16.mxu0 %v3789_v30  ;;  %1563 = vmatprep.mubr.bf16.mxu1 %v3789_v30 }
 0x1dd   : > { %2896 = vmatpush3.bf16.msra.mxu0 %v3432_v16  ;;  %2960 = vmatpush3.bf16.msra.mxu1 %v3434_v20 }
 0x1de   : > { %2897 = vmatprep.subr.bf16.mxu0 %v3435_v21  ;;  %2961 = vmatprep.subr.bf16.mxu1 %v3437_v45 }
 0x1e1   : > { %2898 = vmatpush3.bf16.msra.mxu0 %v3436_v22  ;;  %2962 = vmatpush3.bf16.msra.mxu1 %v3438_v25 }
 0x1e2   : > { %2899 = vmatprep.subr.bf16.mxu0 %v3439_v52  ;;  %2963 = vmatprep.subr.bf16.mxu1 %v3441_v26 }
 0x1e3   : > { %2754 = vmatmul.mubr.msk.bf16.gmra.mrb[8].mxu0 %vm751_vm6, %v4355_v33  ;;  %2762 = vmatmul.mubr.msk.bf16.gmra.mrb[8].mxu1 %vm751_vm6, %v4355_v33  ;;  %v3451_v33 = vld [vmem:[#allocation9 + $0x78] sm:$0xff]  }
 0x1e4   : > { %1460 = vmatprep.mubr.bf16.mxu0 %v3789_v30  ;;  %1573 = vmatprep.mubr.bf16.mxu1 %v3789_v30 }
 0x1e5   : > { %2900 = vmatpush3.bf16.msra.mxu0 %v3440_v17  ;;  %2964 = vmatpush3.bf16.msra.mxu1 %v3442_v0 }
 0x1e6   : > { %2901 = vmatprep.subr.bf16.mxu0 %v3443_v10  ;;  %2965 = vmatprep.subr.bf16.mxu1 %v3445_v23 }
 0x1e9   : > { %2902 = vmatpush3.bf16.msra.mxu0 %v3444_v55  ;;  %2966 = vmatpush3.bf16.msra.mxu1 %v3446_v28 }
 0x1ea   : > { %2903 = vmatprep.subr.bf16.mxu0 %v3447_v6  ;;  %2967 = vmatprep.subr.bf16.mxu1 %v3449_v58 }
 0x1eb   : > { %2755 = vmatmul.mubr.msk.bf16.gmra.mrb[12].mxu0 %vm751_vm6, %v4371_v18  ;;  %2763 = vmatmul.mubr.msk.bf16.gmra.mrb[12].mxu1 %vm751_vm6, %v4371_v18  ;;  %v3453_v18 = vld [vmem:[#allocation9 + $0xf8] sm:$0xff]  }
 0x1ec   : > { %1470 = vmatprep.mubr.bf16.mxu0 %v3789_v30  ;;  %1583 = vmatprep.mubr.bf16.mxu1 %v3789_v30 }
 0x1ed   : > { %2904 = vmatpush3.bf16.msra.mxu0 %v3448_v59  ;;  %2968 = vmatpush3.bf16.msra.mxu1 %v3450_v31 }
 0x1ee   : > { %2905 = vmatprep.subr.bf16.mxu0 %v3451_v33  ;;  %2969 = vmatprep.subr.bf16.mxu1 %v3453_v18 }
 0x1f3   : > { %2756 = vmatmul.mubr.msk.bf16.gmra.mrb[16].mxu0 %vm751_vm6, %v4381_v60  ;;  %2764 = vmatmul.mubr.msk.bf16.gmra.mrb[16].mxu1 %vm751_vm6, %v4381_v60  ;;  %v3452_v60 = vld [vmem:[#allocation9 + $0x38] sm:$0xff]  }
 0x1f4   : > { %1480 = vmatprep.mubr.bf16.mxu0 %v3789_v30  ;;  %1593 = vmatprep.mubr.bf16.mxu1 %v3789_v30 }
 0x1f5   : > { %2906 = vmatpush3.bf16.msra.mxu0 %v3452_v60 }
 0x1fb   : > { %2757 = vmatmul.mubr.msk.bf16.gmra.mrb[20].mxu0 %vm751_vm6, %v4397_v15  ;;  %2765 = vmatmul.mubr.msk.bf16.gmra.mrb[20].mxu1 %vm751_vm6, %v4397_v15  ;;  %v3454_v15 = vld [vmem:[#allocation9 + $0xb8] sm:$0xff]  }
 0x1fc   : > { %1490 = vmatprep.mubr.bf16.mxu0 %v3789_v30  ;;  %1603 = vmatprep.mubr.bf16.mxu1 %v3789_v30 }
 0x1fd   : > { %2970 = vmatpush3.bf16.msra.mxu1 %v3454_v15 }
 0x203   : > { %2758 = vmatmul.mubr.msk.bf16.gmra.mrb[24].mxu0 %vm751_vm6, %v4407_v27  ;;  %2766 = vmatmul.mubr.msk.bf16.gmra.mrb[24].mxu1 %vm751_vm6, %v4407_v27  ;;  %v1691_v27 = vshrl.u32 %v1690_v32, 7 }
 0x204   : > { %1500 = vmatprep.mubr.bf16.mxu0 %v3789_v30  ;;  %1613 = vmatprep.mubr.bf16.mxu1 %v3789_v30  ;;  %v1688_v30 = vld [vmem:[%s4808_s3] sm:$0xf] }
 0x205   : > { %v1692_v57 = vsub.s32 0, %v1691_v27  ;;  %v1700_v35 = vsub.s32 2, %v1691_v27  ;;  %v1696_v36 = vsub.s32 1, %v1691_v27  ;;  %v1704_v2 = vsub.s32 3, %v1691_v27 }
 0x207   : > { %v4550_v61 = vrot.slane %v1688_v30, %v1692_v57  ;;  %v4552_v54 = vrot.slane %v1688_v30, %v1700_v35  ;;  %v4554_v24 = vrot.slane %v1688_v30, %v1696_v36  ;;  %v4556_v12 = vrot.slane %v1688_v30, %v1704_v2 }
 0x20b   : > { %2759 = vmatmul.mubr.msk.bf16.gmra.mrb[28].mxu0 %vm751_vm6, %v4446_v37  ;;  %2767 = vmatmul.mubr.msk.bf16.gmra.mrb[28].mxu1 %vm751_vm6, %v4446_v37 }
 0x2a6   : > { %v1432_v38 = vpop.f32.mrb[0].mxu0  ;;  %v1545_v39 = vpop.f32.mrb[0].mxu1 }
 0x2a7   : > { %v1710_v40 = vadd.f32 %v4550_v61, %v1432_v38  ;;  %v1712_v63 = vadd.f32 %v4552_v54, %v1545_v39  ;;  %v1434_v43 = vpop.f32.mrb[1].mxu0  ;;  %v1547_v62 = vpop.f32.mrb[1].mxu1 }
 0x2a8   : > { %v1711_v19 = vadd.f32 %v4554_v24, %v1434_v43  ;;  %v1713_v44 = vadd.f32 %v4556_v12, %v1547_v62  ;;  %v1436_v46 = vpop.f32.mrb[2].mxu0  ;;  %v1549_v48 = vpop.f32.mrb[2].mxu1 }
 0x2a9   : > { %v1714_v37 = vadd.f32 %v4550_v61, %v1436_v46  ;;  %v1716_v34 = vadd.f32 %v4552_v54, %v1549_v48  ;;  %v1438_v51 = vpop.f32.mrb[3].mxu0  ;;  %v1551_v53 = vpop.f32.mrb[3].mxu1  ;;  %v1774_v42 = vmax.f32 %v1710_v40, 0.0  ;;  %v1776_v1 = vmax.f32 %v1712_v63, 0.0 }
 0x2aa   : > { %v1715_v56 = vadd.f32 %v4554_v24, %v1438_v51  ;;  %v1717_v29 = vadd.f32 %v4556_v12, %v1551_v53  ;;  %v1775_v4 = vmax.f32 %v1711_v19, 0.0  ;;  %v1777_v5 = vmax.f32 %v1713_v44, 0.0 }
 0x2ab   : > { %v1778_v13 = vmax.f32 %v1714_v37, 0.0  ;;  %v1780_v3 = vmax.f32 %v1716_v34, 0.0 }
 0x2ac   : > { %v1779_v50 = vmax.f32 %v1715_v56, 0.0  ;;  %v1781_v41 = vmax.f32 %v1717_v29, 0.0 }
 0x2ad   : > { %v1838_v7 = vpack.c.bf16 %v1778_v13, %v1774_v42  ;;  %v1840_v47 = vpack.c.bf16 %v1780_v3, %v1776_v1 }
 0x2ae   : > { %v1839_v49 = vpack.c.bf16 %v1779_v50, %v1775_v4  ;;  %v1841_v8 = vpack.c.bf16 %v1781_v41, %v1777_v5  ;;  %v1442_v9 = vpop.f32.mrb[4].mxu0  ;;  %v1555_v11 = vpop.f32.mrb[4].mxu1 }
 0x2af   : > { %v1718_v14 = vadd.f32 %v4550_v61, %v1442_v9  ;;  %v1720_v16 = vadd.f32 %v4552_v54, %v1555_v11  ;;  %v1444_v20 = vpop.f32.mrb[5].mxu0  ;;  %v1557_v21 = vpop.f32.mrb[5].mxu1 }
 0x2b0   : > { %v1719_v45 = vadd.f32 %v4554_v24, %v1444_v20  ;;  %v1721_v22 = vadd.f32 %v4556_v12, %v1557_v21  ;;  %v1446_v25 = vpop.f32.mrb[6].mxu0  ;;  %v1559_v52 = vpop.f32.mrb[6].mxu1  ;;  %2165 = vmatprep.mubr.bf16.mxu0 %v1839_v49  ;;  %2262 = vmatprep.mubr.bf16.mxu1 %v1841_v8 }
 0x2b1   : > { %v1722_v26 = vadd.f32 %v4550_v61, %v1446_v25  ;;  %v1724_v17 = vadd.f32 %v4552_v54, %v1559_v52  ;;  %v1448_v0 = vpop.f32.mrb[7].mxu0  ;;  %v1561_v10 = vpop.f32.mrb[7].mxu1  ;;  %2166 = vmatmul.mubr.bf16.vlgmr.msra.gmra.mrb[32].mxu0 %v1838_v7  ;;  %2263 = vmatmul.mubr.bf16.vlgmr.msra.gmra.mrb[32].mxu1 %v1840_v47  ;;  %v1782_v28 = vmax.f32 %v1718_v14, 0.0  ;;  %v1784_v6 = vmax.f32 %v1720_v16, 0.0 }
 0x2b2   : > { %v1723_v23 = vadd.f32 %v4554_v24, %v1448_v0  ;;  %v1725_v55 = vadd.f32 %v4556_v12, %v1561_v10  ;;  %v1783_v31 = vmax.f32 %v1719_v45, 0.0  ;;  %v1785_v33 = vmax.f32 %v1721_v22, 0.0 }
 0x2b3   : > { %v1786_v58 = vmax.f32 %v1722_v26, 0.0  ;;  %v1788_v59 = vmax.f32 %v1724_v17, 0.0 }
 0x2b4   : > { %v1787_v18 = vmax.f32 %v1723_v23, 0.0  ;;  %v1789_v60 = vmax.f32 %v1725_v55, 0.0 }
 0x2b5   : > { %v1842_v15 = vpack.c.bf16 %v1786_v58, %v1782_v28  ;;  %v1844_v27 = vpack.c.bf16 %v1788_v59, %v1784_v6 }
 0x2b6   : > { %v1843_v57 = vpack.c.bf16 %v1787_v18, %v1783_v31  ;;  %v1845_v35 = vpack.c.bf16 %v1789_v60, %v1785_v33  ;;  %v1452_v30 = vpop.f32.mrb[8].mxu0  ;;  %v1565_v36 = vpop.f32.mrb[8].mxu1 }
 0x2b7   : > { %v1726_v2 = vadd.f32 %v4550_v61, %v1452_v30  ;;  %v1728_v38 = vadd.f32 %v4552_v54, %v1565_v36  ;;  %v1454_v39 = vpop.f32.mrb[9].mxu0  ;;  %v1567_v40 = vpop.f32.mrb[9].mxu1 }
 0x2b8   : > { %v1727_v63 = vadd.f32 %v4554_v24, %v1454_v39  ;;  %v1729_v43 = vadd.f32 %v4556_v12, %v1567_v40  ;;  %v1456_v62 = vpop.f32.mrb[10].mxu0  ;;  %v1569_v19 = vpop.f32.mrb[10].mxu1  ;;  %2173 = vmatprep.mubr.bf16.mxu0 %v1843_v57  ;;  %2270 = vmatprep.mubr.bf16.mxu1 %v1845_v35 }
 0x2b9   : > { %v1730_v44 = vadd.f32 %v4550_v61, %v1456_v62  ;;  %v1732_v46 = vadd.f32 %v4552_v54, %v1569_v19  ;;  %v1458_v48 = vpop.f32.mrb[11].mxu0  ;;  %v1571_v37 = vpop.f32.mrb[11].mxu1  ;;  %2174 = vmatmul.mubr.bf16.gmra.mrb[36].mxu0 %v1842_v15  ;;  %2271 = vmatmul.mubr.bf16.gmra.mrb[36].mxu1 %v1844_v27  ;;  %v1790_v53 = vmax.f32 %v1726_v2, 0.0  ;;  %v1792_v56 = vmax.f32 %v1728_v38, 0.0 }
 0x2ba   : > { %v1731_v34 = vadd.f32 %v4554_v24, %v1458_v48  ;;  %v1733_v51 = vadd.f32 %v4556_v12, %v1571_v37  ;;  %v1791_v1 = vmax.f32 %v1727_v63, 0.0  ;;  %v1793_v13 = vmax.f32 %v1729_v43, 0.0 }
 0x2bb   : > { %v1794_v29 = vmax.f32 %v1730_v44, 0.0  ;;  %v1796_v42 = vmax.f32 %v1732_v46, 0.0 }
 0x2bc   : > { %v1795_v3 = vmax.f32 %v1731_v34, 0.0  ;;  %v1797_v4 = vmax.f32 %v1733_v51, 0.0 }
 0x2bd   : > { %v1846_v5 = vpack.c.bf16 %v1794_v29, %v1790_v53  ;;  %v1848_v50 = vpack.c.bf16 %v1796_v42, %v1792_v56 }
 0x2be   : > { %v1847_v41 = vpack.c.bf16 %v1795_v3, %v1791_v1  ;;  %v1849_v7 = vpack.c.bf16 %v1797_v4, %v1793_v13  ;;  %v1462_v47 = vpop.f32.mrb[12].mxu0  ;;  %v1575_v49 = vpop.f32.mrb[12].mxu1 }
 0x2bf   : > { %v1734_v8 = vadd.f32 %v4550_v61, %v1462_v47  ;;  %v1736_v9 = vadd.f32 %v4552_v54, %v1575_v49  ;;  %v1464_v11 = vpop.f32.mrb[13].mxu0  ;;  %v1577_v14 = vpop.f32.mrb[13].mxu1 }
 0x2c0   : > { %v1735_v16 = vadd.f32 %v4554_v24, %v1464_v11  ;;  %v1737_v20 = vadd.f32 %v4556_v12, %v1577_v14  ;;  %v1466_v21 = vpop.f32.mrb[14].mxu0  ;;  %v1579_v45 = vpop.f32.mrb[14].mxu1  ;;  %2181 = vmatprep.mubr.bf16.mxu0 %v1847_v41  ;;  %2278 = vmatprep.mubr.bf16.mxu1 %v1849_v7 }
 0x2c1   : > { %v1738_v22 = vadd.f32 %v4550_v61, %v1466_v21  ;;  %v1740_v25 = vadd.f32 %v4552_v54, %v1579_v45  ;;  %v1468_v52 = vpop.f32.mrb[15].mxu0  ;;  %v1581_v26 = vpop.f32.mrb[15].mxu1  ;;  %2182 = vmatmul.mubr.bf16.gmra.mrb[40].mxu0 %v1846_v5  ;;  %2279 = vmatmul.mubr.bf16.gmra.mrb[40].mxu1 %v1848_v50  ;;  %v1798_v10 = vmax.f32 %v1734_v8, 0.0  ;;  %v1800_v23 = vmax.f32 %v1736_v9, 0.0 }
 0x2c2   : > { %v1739_v17 = vadd.f32 %v4554_v24, %v1468_v52  ;;  %v1741_v0 = vadd.f32 %v4556_v12, %v1581_v26  ;;  %v1799_v6 = vmax.f32 %v1735_v16, 0.0  ;;  %v1801_v58 = vmax.f32 %v1737_v20, 0.0 }
 0x2c3   : > { %v1802_v55 = vmax.f32 %v1738_v22, 0.0  ;;  %v1804_v28 = vmax.f32 %v1740_v25, 0.0 }
 0x2c4   : > { %v1803_v59 = vmax.f32 %v1739_v17, 0.0  ;;  %v1805_v31 = vmax.f32 %v1741_v0, 0.0 }
 0x2c5   : > { %v1850_v33 = vpack.c.bf16 %v1802_v55, %v1798_v10  ;;  %v1852_v18 = vpack.c.bf16 %v1804_v28, %v1800_v23 }
 0x2c6   : > { %v1851_v60 = vpack.c.bf16 %v1803_v59, %v1799_v6  ;;  %v1853_v15 = vpack.c.bf16 %v1805_v31, %v1801_v58  ;;  %v1472_v27 = vpop.f32.mrb[16].mxu0  ;;  %v1585_v57 = vpop.f32.mrb[16].mxu1 }
 0x2c7   : > { %v1742_v35 = vadd.f32 %v4550_v61, %v1472_v27  ;;  %v1744_v30 = vadd.f32 %v4552_v54, %v1585_v57  ;;  %v1474_v36 = vpop.f32.mrb[17].mxu0  ;;  %v1587_v2 = vpop.f32.mrb[17].mxu1 }
 0x2c8   : > { %v1743_v38 = vadd.f32 %v4554_v24, %v1474_v36  ;;  %v1745_v39 = vadd.f32 %v4556_v12, %v1587_v2  ;;  %v1476_v40 = vpop.f32.mrb[18].mxu0  ;;  %v1589_v63 = vpop.f32.mrb[18].mxu1  ;;  %2189 = vmatprep.mubr.bf16.mxu0 %v1851_v60  ;;  %2286 = vmatprep.mubr.bf16.mxu1 %v1853_v15 }
 0x2c9   : > { %v1746_v43 = vadd.f32 %v4550_v61, %v1476_v40  ;;  %v1748_v62 = vadd.f32 %v4552_v54, %v1589_v63  ;;  %v1478_v19 = vpop.f32.mrb[19].mxu0  ;;  %v1591_v44 = vpop.f32.mrb[19].mxu1  ;;  %2190 = vmatmul.mubr.bf16.gmra.mrb[44].mxu0 %v1850_v33  ;;  %2287 = vmatmul.mubr.bf16.gmra.mrb[44].mxu1 %v1852_v18  ;;  %v1806_v37 = vmax.f32 %v1742_v35, 0.0  ;;  %v1808_v34 = vmax.f32 %v1744_v30, 0.0 }
 0x2ca   : > { %v1747_v46 = vadd.f32 %v4554_v24, %v1478_v19  ;;  %v1749_v48 = vadd.f32 %v4556_v12, %v1591_v44  ;;  %v1807_v56 = vmax.f32 %v1743_v38, 0.0  ;;  %v1809_v29 = vmax.f32 %v1745_v39, 0.0 }
 0x2cb   : > { %v1810_v51 = vmax.f32 %v1746_v43, 0.0  ;;  %v1812_v53 = vmax.f32 %v1748_v62, 0.0 }
 0x2cc   : > { %v1811_v42 = vmax.f32 %v1747_v46, 0.0  ;;  %v1813_v1 = vmax.f32 %v1749_v48, 0.0 }
 0x2cd   : > { %v1854_v13 = vpack.c.bf16 %v1810_v51, %v1806_v37  ;;  %v1856_v3 = vpack.c.bf16 %v1812_v53, %v1808_v34 }
 0x2ce   : > { %v1855_v4 = vpack.c.bf16 %v1811_v42, %v1807_v56  ;;  %v1857_v5 = vpack.c.bf16 %v1813_v1, %v1809_v29  ;;  %v1482_v50 = vpop.f32.mrb[20].mxu0  ;;  %v1595_v41 = vpop.f32.mrb[20].mxu1 }
 0x2cf   : > { %v1750_v7 = vadd.f32 %v4550_v61, %v1482_v50  ;;  %v1752_v47 = vadd.f32 %v4552_v54, %v1595_v41  ;;  %v1484_v49 = vpop.f32.mrb[21].mxu0  ;;  %v1597_v8 = vpop.f32.mrb[21].mxu1 }
 0x2d0   : > { %v1751_v9 = vadd.f32 %v4554_v24, %v1484_v49  ;;  %v1753_v11 = vadd.f32 %v4556_v12, %v1597_v8  ;;  %v1486_v14 = vpop.f32.mrb[22].mxu0  ;;  %v1599_v16 = vpop.f32.mrb[22].mxu1  ;;  %2197 = vmatprep.mubr.bf16.mxu0 %v1855_v4  ;;  %2294 = vmatprep.mubr.bf16.mxu1 %v1857_v5 }
 0x2d1   : > { %v1754_v20 = vadd.f32 %v4550_v61, %v1486_v14  ;;  %v1756_v21 = vadd.f32 %v4552_v54, %v1599_v16  ;;  %v1488_v45 = vpop.f32.mrb[23].mxu0  ;;  %v1601_v22 = vpop.f32.mrb[23].mxu1  ;;  %2198 = vmatmul.mubr.bf16.gmra.mrb[48].mxu0 %v1854_v13  ;;  %2295 = vmatmul.mubr.bf16.gmra.mrb[48].mxu1 %v1856_v3  ;;  %v1814_v26 = vmax.f32 %v1750_v7, 0.0  ;;  %v1816_v17 = vmax.f32 %v1752_v47, 0.0 }
 0x2d2   : > { %v1755_v25 = vadd.f32 %v4554_v24, %v1488_v45  ;;  %v1757_v52 = vadd.f32 %v4556_v12, %v1601_v22  ;;  %v1815_v23 = vmax.f32 %v1751_v9, 0.0  ;;  %v1817_v55 = vmax.f32 %v1753_v11, 0.0 }
 0x2d3   : > { %v1818_v0 = vmax.f32 %v1754_v20, 0.0  ;;  %v1820_v10 = vmax.f32 %v1756_v21, 0.0 }
 0x2d4   : > { %v1819_v28 = vmax.f32 %v1755_v25, 0.0  ;;  %v1821_v6 = vmax.f32 %v1757_v52, 0.0 }
 0x2d5   : > { %v1858_v58 = vpack.c.bf16 %v1818_v0, %v1814_v26  ;;  %v1860_v59 = vpack.c.bf16 %v1820_v10, %v1816_v17 }
 0x2d6   : > { %v1859_v31 = vpack.c.bf16 %v1819_v28, %v1815_v23  ;;  %v1861_v33 = vpack.c.bf16 %v1821_v6, %v1817_v55  ;;  %v1492_v18 = vpop.f32.mrb[24].mxu0  ;;  %v1605_v60 = vpop.f32.mrb[24].mxu1 }
 0x2d7   : > { %v1758_v15 = vadd.f32 %v4550_v61, %v1492_v18  ;;  %v1760_v27 = vadd.f32 %v4552_v54, %v1605_v60  ;;  %v1494_v57 = vpop.f32.mrb[25].mxu0  ;;  %v1607_v35 = vpop.f32.mrb[25].mxu1 }
 0x2d8   : > { %v1759_v30 = vadd.f32 %v4554_v24, %v1494_v57  ;;  %v1761_v36 = vadd.f32 %v4556_v12, %v1607_v35  ;;  %v1496_v2 = vpop.f32.mrb[26].mxu0  ;;  %v1609_v38 = vpop.f32.mrb[26].mxu1  ;;  %2205 = vmatprep.mubr.bf16.mxu0 %v1859_v31  ;;  %2302 = vmatprep.mubr.bf16.mxu1 %v1861_v33 }
 0x2d9   : > { %v1762_v39 = vadd.f32 %v4550_v61, %v1496_v2  ;;  %v1764_v40 = vadd.f32 %v4552_v54, %v1609_v38  ;;  %v1498_v63 = vpop.f32.mrb[27].mxu0  ;;  %v1611_v43 = vpop.f32.mrb[27].mxu1  ;;  %2206 = vmatmul.mubr.bf16.gmra.mrb[52].mxu0 %v1858_v58  ;;  %2303 = vmatmul.mubr.bf16.gmra.mrb[52].mxu1 %v1860_v59  ;;  %v1822_v44 = vmax.f32 %v1758_v15, 0.0  ;;  %v1824_v46 = vmax.f32 %v1760_v27, 0.0 }
 0x2da   : > { %v1763_v62 = vadd.f32 %v4554_v24, %v1498_v63  ;;  %v1765_v19 = vadd.f32 %v4556_v12, %v1611_v43  ;;  %v1823_v34 = vmax.f32 %v1759_v30, 0.0  ;;  %v1825_v51 = vmax.f32 %v1761_v36, 0.0 }
 0x2db   : > { %v1826_v48 = vmax.f32 %v1762_v39, 0.0  ;;  %v1828_v37 = vmax.f32 %v1764_v40, 0.0 }
 0x2dc   : > { %v1827_v53 = vmax.f32 %v1763_v62, 0.0  ;;  %v1829_v56 = vmax.f32 %v1765_v19, 0.0 }
 0x2dd   : > { %v1862_v29 = vpack.c.bf16 %v1826_v48, %v1822_v44  ;;  %v1864_v42 = vpack.c.bf16 %v1828_v37, %v1824_v46 }
 0x2de   : > { %v1863_v1 = vpack.c.bf16 %v1827_v53, %v1823_v34  ;;  %v1865_v13 = vpack.c.bf16 %v1829_v56, %v1825_v51  ;;  %v1502_v3 = vpop.f32.mrb[28].mxu0  ;;  %v1615_v4 = vpop.f32.mrb[28].mxu1 }
 0x2df   : > { %v1766_v5 = vadd.f32 %v4550_v61, %v1502_v3  ;;  %v1768_v50 = vadd.f32 %v4552_v54, %v1615_v4  ;;  %v1504_v41 = vpop.f32.mrb[29].mxu0  ;;  %v1617_v7 = vpop.f32.mrb[29].mxu1 }
 0x2e0   : > { %v1767_v47 = vadd.f32 %v4554_v24, %v1504_v41  ;;  %v1769_v49 = vadd.f32 %v4556_v12, %v1617_v7  ;;  %v1506_v8 = vpop.f32.mrb[30].mxu0  ;;  %v1619_v9 = vpop.f32.mrb[30].mxu1  ;;  %2213 = vmatprep.mubr.bf16.mxu0 %v1863_v1  ;;  %2310 = vmatprep.mubr.bf16.mxu1 %v1865_v13 }
 0x2e1   : > { %v1770_v11 = vadd.f32 %v4550_v61, %v1506_v8  ;;  %v1772_v14 = vadd.f32 %v4552_v54, %v1619_v9  ;;  %v1508_v16 = vpop.f32.mrb[31].mxu0  ;;  %v1621_v20 = vpop.f32.mrb[31].mxu1  ;;  %2214 = vmatmul.mubr.bf16.gmra.mrb[56].mxu0 %v1862_v29  ;;  %2311 = vmatmul.mubr.bf16.gmra.mrb[56].mxu1 %v1864_v42  ;;  %v1830_v22 = vmax.f32 %v1766_v5, 0.0  ;;  %v1832_v25 = vmax.f32 %v1768_v50, 0.0 }
 0x2e2   : > { %v1771_v21 = vadd.f32 %v4554_v24, %v1508_v16  ;;  %v1773_v45 = vadd.f32 %v4556_v12, %v1621_v20  ;;  %v1831_v17 = vmax.f32 %v1767_v47, 0.0  ;;  %v1833_v0 = vmax.f32 %v1769_v49, 0.0  ;;  %v4625_v12 = vld [vmem:[%s4848_s21] ss:$0 sm:$0xff] }
 0x2e3   : > { %v1834_v52 = vmax.f32 %v1770_v11, 0.0  ;;  %v1836_v26 = vmax.f32 %v1772_v14, 0.0 }
 0x2e4   : > { %v1835_v10 = vmax.f32 %v1771_v21, 0.0  ;;  %v1837_v23 = vmax.f32 %v1773_v45, 0.0 }
 0x2e5   : > { %v1866_v55 = vpack.c.bf16 %v1834_v52, %v1830_v22  ;;  %v1868_v61 = vpack.c.bf16 %v1836_v26, %v1832_v25 }
 0x2e6   : > { %v1867_v28 = vpack.c.bf16 %v1835_v10, %v1831_v17  ;;  %v1869_v54 = vpack.c.bf16 %v1837_v23, %v1833_v0 }
 0x2e8   : > { %2221 = vmatprep.mubr.bf16.mxu0 %v1867_v28  ;;  %2318 = vmatprep.mubr.bf16.mxu1 %v1869_v54 }
 0x2e9   : > { %2222 = vmatmul.mubr.bf16.gmra.mrb[60].mxu0 %v1866_v55  ;;  %2319 = vmatmul.mubr.bf16.gmra.mrb[60].mxu1 %v1868_v61 }
 0x384   : > { %v2907_v6 = vpop.f32.mrb[32].mxu0  ;;  %v2971_v24 = vpop.f32.mrb[32].mxu1 }
 0x385   : > { %v2908_v58 = vpop.f32.mrb[33].mxu0  ;;  %v2972_v59 = vpop.f32.mrb[33].mxu1 }
 0x386   : > { %v2909_v31 = vadd.f32 %v2908_v58, %v2907_v6  ;;  %v2973_v33 = vadd.f32 %v2972_v59, %v2971_v24  ;;  %v2910_v18 = vpop.f32.mrb[34].mxu0  ;;  %v2974_v60 = vpop.f32.mrb[34].mxu1 }
 0x387   : > { %v2911_v15 = vpop.f32.mrb[35].mxu0  ;;  %v2975_v27 = vpop.f32.mrb[35].mxu1 }
 0x388   : > { %v2168_v57 = vadd.f32 %v2909_v31, %v4625_v12  ;;  %v2912_v35 = vadd.f32 %v2911_v15, %v2910_v18  ;;  %v2976_v30 = vadd.f32 %v2975_v27, %v2974_v60 }
 0x38a   : > { %v4628_v36 = vadd.f32 %v2973_v33, %v2168_v57  ;;  %v2171_v2 = vadd.f32 %v2912_v35, %v4625_v12 }
 0x38c   : > { %v2329_v38 = vsub.f32 0.0, %v4628_v36  ;;  %v4632_v39 = vadd.f32 %v2976_v30, %v2171_v2  ;;  %v2913_v40 = vpop.f32.mrb[36].mxu0  ;;  %v2977_v63 = vpop.f32.mrb[36].mxu1 }
 0x38d   : > { %v2914_v43 = vpop.f32.mrb[37].mxu0  ;;  %v2978_v62 = vpop.f32.mrb[37].mxu1 }
 0x38e   : > { %v2345_v19 = vmul.f32 1.442695, %v2329_v38  ;;  %v2330_v44 = vsub.f32 0.0, %v4632_v39  ;;  %v2915_v46 = vadd.f32 %v2914_v43, %v2913_v40  ;;  %v2979_v48 = vadd.f32 %v2978_v62, %v2977_v63  ;;  %v2916_v37 = vpop.f32.mrb[38].mxu0  ;;  %v2980_v34 = vpop.f32.mrb[38].mxu1 }
 0x38f   : > { %v2917_v51 = vpop.f32.mrb[39].mxu0  ;;  %v2981_v53 = vpop.f32.mrb[39].mxu1  ;;  %v4656_v62 = vand.u32 127, %v1690_v32 }
 0x390   : > { %3455 = vpow2.f32 %v2345_v19  ;;  %v2347_v56 = vmul.f32 1.442695, %v2330_v44  ;;  %v2176_v29 = vadd.f32 %v2915_v46, %v4625_v12  ;;  %v2918_v42 = vadd.f32 %v2917_v51, %v2916_v37 }
 0x391   : > { %v2982_v1 = vadd.f32 %v2981_v53, %v2980_v34  ;;  %vm2409_vm7 = vcmp.lt.s32.totalorder %v4656_v62, 18 }
 0x392   : > { %3457 = vpow2.f32 %v2347_v56  ;;  %v4636_v13 = vadd.f32 %v2979_v48, %v2176_v29  ;;  %v2179_v3 = vadd.f32 %v2918_v42, %v4625_v12 }
 0x394   : > { %v2331_v4 = vsub.f32 0.0, %v4636_v13  ;;  %v4640_v5 = vadd.f32 %v2982_v1, %v2179_v3  ;;  %v2919_v50 = vpop.f32.mrb[40].mxu0  ;;  %v2983_v41 = vpop.f32.mrb[40].mxu1 }
 0x395   : > { %v2920_v7 = vpop.f32.mrb[41].mxu0  ;;  %v2984_v47 = vpop.f32.mrb[41].mxu1 }
 0x396   : > { %v2349_v49 = vmul.f32 1.442695, %v2331_v4  ;;  %v2332_v8 = vsub.f32 0.0, %v4640_v5  ;;  %v2921_v9 = vadd.f32 %v2920_v7, %v2919_v50  ;;  %v2985_v11 = vadd.f32 %v2984_v47, %v2983_v41  ;;  %v2922_v14 = vpop.f32.mrb[42].mxu0  ;;  %v2986_v16 = vpop.f32.mrb[42].mxu1 }
 0x397   : > { %v2923_v20 = vpop.f32.mrb[43].mxu0  ;;  %v2987_v21 = vpop.f32.mrb[43].mxu1 }
 0x398   : > { %3459 = vpow2.f32 %v2349_v49  ;;  %v2351_v45 = vmul.f32 1.442695, %v2332_v8  ;;  %v2184_v22 = vadd.f32 %v2921_v9, %v4625_v12  ;;  %v2924_v25 = vadd.f32 %v2923_v20, %v2922_v14 }
 0x399   : > { %v2988_v52 = vadd.f32 %v2987_v21, %v2986_v16 }
 0x39a   : > { %v3456_v26 = vpop.eup %3455  ;;  %3461 = vpow2.f32 %v2351_v45  ;;  %v4644_v17 = vadd.f32 %v2985_v11, %v2184_v22  ;;  %v2187_v0 = vadd.f32 %v2924_v25, %v4625_v12 }
 0x39b   : > { %v2377_v10 = vadd.f32 1.0, %v3456_v26 }
 0x39c   : > { %v3458_v23 = vpop.eup %3457  ;;  %v2333_v55 = vsub.f32 0.0, %v4644_v17  ;;  %v4648_v61 = vadd.f32 %v2988_v52, %v2187_v0  ;;  %v2925_v28 = vpop.f32.mrb[44].mxu0 }
 0x39d   : > { %v2989_v54 = vpop.f32.mrb[44].mxu1  ;;  %3463 = vrcp.f32 %v2377_v10  ;;  %v2378_v6 = vadd.f32 1.0, %v3458_v23  ;;  %v2926_v24 = vpop.f32.mrb[45].mxu0 }
 0x39e   : > { %v2990_v58 = vpop.f32.mrb[45].mxu1  ;;  %v2353_v59 = vmul.f32 1.442695, %v2333_v55  ;;  %v2334_v31 = vsub.f32 0.0, %v4648_v61  ;;  %v2927_v33 = vadd.f32 %v2926_v24, %v2925_v28  ;;  %v2928_v60 = vpop.f32.mrb[46].mxu0 }
 0x39f   : > { %v2991_v18 = vadd.f32 %v2990_v58, %v2989_v54  ;;  %v2992_v15 = vpop.f32.mrb[46].mxu1  ;;  %3465 = vrcp.f32 %v2378_v6  ;;  %v2929_v27 = vpop.f32.mrb[47].mxu0 }
 0x3a0   : > { %v2993_v57 = vpop.f32.mrb[47].mxu1  ;;  %3467 = vpow2.f32 %v2353_v59  ;;  %v2355_v35 = vmul.f32 1.442695, %v2334_v31  ;;  %v2192_v30 = vadd.f32 %v2927_v33, %v4625_v12  ;;  %v2930_v2 = vadd.f32 %v2929_v27, %v2928_v60 }
 0x3a1   : > { %v2994_v38 = vadd.f32 %v2993_v57, %v2992_v15 }
 0x3a2   : > { %v3460_v40 = vpop.eup %3459  ;;  %3469 = vpow2.f32 %v2355_v35  ;;  %v4652_v63 = vadd.f32 %v2991_v18, %v2192_v30  ;;  %v2195_v43 = vadd.f32 %v2930_v2, %v4625_v12 }
 0x3a3   : > { %v2379_v19 = vadd.f32 1.0, %v3460_v40 }
 0x3a4   : > { %v3462_v44 = vpop.eup %3461  ;;  %v2335_v46 = vsub.f32 0.0, %v4652_v63  ;;  %v4659_v48 = vadd.f32 %v2994_v38, %v2195_v43  ;;  %v2931_v37 = vpop.f32.mrb[48].mxu0 }
 0x3a5   : > { %v2995_v34 = vpop.f32.mrb[48].mxu1  ;;  %3471 = vrcp.f32 %v2379_v19  ;;  %v2380_v51 = vadd.f32 1.0, %v3462_v44  ;;  %v2932_v53 = vpop.f32.mrb[49].mxu0 }
 0x3a6   : > { %v2996_v56 = vpop.f32.mrb[49].mxu1  ;;  %v2357_v29 = vmul.f32 1.442695, %v2335_v46  ;;  %v2336_v42 = vsub.f32 0.0, %v4659_v48  ;;  %v2933_v1 = vadd.f32 %v2932_v53, %v2931_v37  ;;  %v2934_v4 = vpop.f32.mrb[50].mxu0 }
 0x3a7   : > { %v2997_v3 = vadd.f32 %v2996_v56, %v2995_v34  ;;  %v2998_v32 = vpop.f32.mrb[50].mxu1  ;;  %v3464_v50 = vpop.eup %3463  ;;  %3473 = vrcp.f32 %v2380_v51 }
 0x3a8   : > { %v2935_v41 = vpop.f32.mrb[51].mxu0  ;;  %v2999_v7 = vpop.f32.mrb[51].mxu1  ;;  %3475 = vpow2.f32 %v2357_v29  ;;  %v2359_v47 = vmul.f32 1.442695, %v2336_v42  ;;  %v2200_v49 = vadd.f32 %v2933_v1, %v4625_v12  ;;  %v2410_v16 = vsel %vm2409_vm7, %v3464_v50, %v4628_v36 }
 0x3a9   : > { %v3466_v8 = vpop.eup %3465  ;;  %v2936_v9 = vadd.f32 %v2935_v41, %v2934_v4  ;;  %v3000_v11 = vadd.f32 %v2999_v7, %v2998_v32 }
 0x3aa   : > { %v3468_v14 = vpop.eup %3467  ;;  %v2411_v20 = vsel %vm2409_vm7, %v3466_v8, %v4632_v39  ;;  %3477 = vpow2.f32 %v2359_v47  ;;  %v4670_v21 = vadd.f32 %v2997_v3, %v2200_v49 }
 0x3ab   : > { %v2847_v45 = vpack.c.bf16 %v2411_v20, %v2410_v16  ;;  %v2381_v22 = vadd.f32 1.0, %v3468_v14  ;;  %v2203_v25 = vadd.f32 %v2936_v9, %v4625_v12 }
 0x3ac   : > { %v3470_v52 = vpop.eup %3469  ;;  %v2337_v26 = vsub.f32 0.0, %v4670_v21  ;;  %v2937_v0 = vpop.f32.mrb[52].mxu0 }
 0x3ad   : > { %v3001_v10 = vpop.f32.mrb[52].mxu1  ;;  %2848 = vst [vmem:[%s4082_s7] sm:$0xff] %v2847_v45   ;;  %3479 = vrcp.f32 %v2381_v22  ;;  %v2382_v23 = vadd.f32 1.0, %v3470_v52  ;;  %v4675_v36 = vadd.f32 %v3000_v11, %v2203_v25  ;;  %v2938_v55 = vpop.f32.mrb[53].mxu0 }
 0x3ae   : > { %v3002_v28 = vpop.f32.mrb[53].mxu1  ;;  %v2361_v39 = vmul.f32 1.442695, %v2337_v26  ;;  %v2939_v54 = vadd.f32 %v2938_v55, %v2937_v0  ;;  %v2940_v24 = vpop.f32.mrb[54].mxu0 }
 0x3af   : > { %v3003_v6 = vadd.f32 %v3002_v28, %v3001_v10  ;;  %v3004_v58 = vpop.f32.mrb[54].mxu1  ;;  %v3472_v59 = vpop.eup %3471  ;;  %3481 = vrcp.f32 %v2382_v23  ;;  %v2338_v31 = vsub.f32 0.0, %v4675_v36 }
 0x3b0   : > { %v2941_v33 = vpop.f32.mrb[55].mxu0  ;;  %v3005_v18 = vpop.f32.mrb[55].mxu1  ;;  %3483 = vpow2.f32 %v2361_v39  ;;  %v2208_v60 = vadd.f32 %v2939_v54, %v4625_v12  ;;  %v2412_v2 = vsel %vm2409_vm7, %v3472_v59, %v4636_v13 }
 0x3b1   : > { %v2942_v15 = vadd.f32 %v2941_v33, %v2940_v24  ;;  %v3474_v27 = vpop.eup %3473  ;;  %v2363_v57 = vmul.f32 1.442695, %v2338_v31  ;;  %v3006_v35 = vadd.f32 %v3005_v18, %v3004_v58 }
 0x3b2   : > { %v3476_v30 = vpop.eup %3475  ;;  %v2413_v38 = vsel %vm2409_vm7, %v3474_v27, %v4640_v5  ;;  %v4685_v40 = vadd.f32 %v3003_v6, %v2208_v60 }
 0x3b3   : > { %v2211_v43 = vadd.f32 %v2942_v15, %v4625_v12  ;;  %v2852_v19 = vpack.c.bf16 %v2413_v38, %v2412_v2  ;;  %v2383_v44 = vadd.f32 1.0, %v3476_v30  ;;  %3485 = vpow2.f32 %v2363_v57 }
 0x3b4   : > { %v3478_v46 = vpop.eup %3477  ;;  %v2339_v37 = vsub.f32 0.0, %v4685_v40  ;;  %v2943_v51 = vpop.f32.mrb[56].mxu0 }
 0x3b5   : > { %v4689_v34 = vadd.f32 %v3006_v35, %v2211_v43  ;;  %v3007_v53 = vpop.f32.mrb[56].mxu1  ;;  %2884 = vst [vmem:[%s4082_s7 + $0x8] sm:$0xff] %v2852_v19   ;;  %3487 = vrcp.f32 %v2383_v44  ;;  %v2384_v13 = vadd.f32 1.0, %v3478_v46  ;;  %v2944_v56 = vpop.f32.mrb[57].mxu0 }
 0x3b6   : > { %v3008_v29 = vpop.f32.mrb[57].mxu1  ;;  %v2365_v5 = vmul.f32 1.442695, %v2339_v37  ;;  %v2945_v1 = vadd.f32 %v2944_v56, %v2943_v51  ;;  %v2946_v4 = vpop.f32.mrb[58].mxu0 }
 0x3b7   : > { %v2340_v42 = vsub.f32 0.0, %v4689_v34  ;;  %v3009_v3 = vadd.f32 %v3008_v29, %v3007_v53  ;;  %v3010_v32 = vpop.f32.mrb[58].mxu1  ;;  %v3480_v50 = vpop.eup %3479  ;;  %3489 = vrcp.f32 %v2384_v13 }
 0x3b8   : > { %v2947_v41 = vpop.f32.mrb[59].mxu0  ;;  %v3011_v7 = vpop.f32.mrb[59].mxu1  ;;  %3491 = vpow2.f32 %v2365_v5  ;;  %v2216_v49 = vadd.f32 %v2945_v1, %v4625_v12  ;;  %v2414_v16 = vsel %vm2409_vm7, %v3480_v50, %v4644_v17 }
 0x3b9   : > { %v2367_v47 = vmul.f32 1.442695, %v2340_v42  ;;  %v3482_v8 = vpop.eup %3481  ;;  %v2948_v9 = vadd.f32 %v2947_v41, %v2946_v4  ;;  %v3012_v11 = vadd.f32 %v3011_v7, %v3010_v32 }
 0x3ba   : > { %v3484_v14 = vpop.eup %3483  ;;  %v2415_v20 = vsel %vm2409_vm7, %v3482_v8, %v4648_v61  ;;  %v4700_v45 = vadd.f32 %v3009_v3, %v2216_v49 }
 0x3bb   : > { %3493 = vpow2.f32 %v2367_v47  ;;  %v2857_v22 = vpack.c.bf16 %v2415_v20, %v2414_v16  ;;  %v2385_v25 = vadd.f32 1.0, %v3484_v14  ;;  %v2219_v52 = vadd.f32 %v2948_v9, %v4625_v12 }
 0x3bc   : > { %v2341_v26 = vsub.f32 0.0, %v4700_v45  ;;  %v2949_v0 = vpop.f32.mrb[60].mxu0  ;;  %v3013_v10 = vpop.f32.mrb[60].mxu1 }
 0x3bd   : > { %v3486_v23 = vpop.eup %3485  ;;  %2885 = vst [vmem:[%s4082_s7 + $0x10] sm:$0xff] %v2857_v22   ;;  %3495 = vrcp.f32 %v2385_v25  ;;  %v4705_v55 = vadd.f32 %v3012_v11, %v2219_v52  ;;  %v2950_v17 = vpop.f32.mrb[61].mxu0 }
 0x3be   : > { %v3014_v28 = vpop.f32.mrb[61].mxu1  ;;  %v2386_v39 = vadd.f32 1.0, %v3486_v23  ;;  %v2369_v61 = vmul.f32 1.442695, %v2341_v26  ;;  %v2951_v54 = vadd.f32 %v2950_v17, %v2949_v0  ;;  %v2952_v24 = vpop.f32.mrb[62].mxu0 }
 0x3bf   : > { %v3015_v6 = vadd.f32 %v3014_v28, %v3013_v10  ;;  %v3016_v58 = vpop.f32.mrb[62].mxu1  ;;  %v3488_v59 = vpop.eup %3487  ;;  %v2342_v31 = vsub.f32 0.0, %v4705_v55 }
 0x3c0   : > { %v2953_v33 = vpop.f32.mrb[63].mxu0  ;;  %v3017_v18 = vpop.f32.mrb[63].mxu1  ;;  %3497 = vrcp.f32 %v2386_v39  ;;  %v2224_v60 = vadd.f32 %v2951_v54, %v4625_v12  ;;  %v2416_v2 = vsel %vm2409_vm7, %v3488_v59, %v4652_v63 }
 0x3c1   : > { %v2954_v15 = vadd.f32 %v2953_v33, %v2952_v24  ;;  %v3490_v27 = vpop.eup %3489  ;;  %3499 = vpow2.f32 %v2369_v61  ;;  %v2371_v57 = vmul.f32 1.442695, %v2342_v31  ;;  %v3018_v35 = vadd.f32 %v3017_v18, %v3016_v58 }
 0x3c2   : > { %v3492_v30 = vpop.eup %3491  ;;  %v2417_v38 = vsel %vm2409_vm7, %v3490_v27, %v4659_v48  ;;  %v2321_v43 = vadd.f32 %v3015_v6, %v2224_v60 }
 0x3c3   : > { %v2227_v19 = vadd.f32 %v2954_v15, %v4625_v12  ;;  %v2862_v44 = vpack.c.bf16 %v2417_v38, %v2416_v2  ;;  %v2387_v46 = vadd.f32 1.0, %v3492_v30  ;;  %3501 = vpow2.f32 %v2371_v57 }
 0x3c4   : > { %v2343_v51 = vsub.f32 0.0, %v2321_v43 }
 0x3c5   : > { %v3494_v37 = vpop.eup %3493  ;;  %v2324_v53 = vadd.f32 %v3018_v35, %v2227_v19  ;;  %2886 = vst [vmem:[%s4082_s7 + $0x18] sm:$0xff] %v2862_v44   ;;  %3503 = vrcp.f32 %v2387_v46 }
 0x3c6   : > { %v2388_v13 = vadd.f32 1.0, %v3494_v37  ;;  %v2373_v56 = vmul.f32 1.442695, %v2343_v51 }
 0x3c7   : > { %v2344_v29 = vsub.f32 0.0, %v2324_v53  ;;  %v3496_v63 = vpop.eup %3495 }
 0x3c8   : > { %3505 = vrcp.f32 %v2388_v13  ;;  %v2418_v12 = vsel %vm2409_vm7, %v3496_v63, %v4670_v21 }
 0x3c9   : > { %3507 = vpow2.f32 %v2373_v56  ;;  %v2375_v5 = vmul.f32 1.442695, %v2344_v29 }
 0x3ca   : > { %v3498_v48 = vpop.eup %3497 }
 0x3cb   : > { %3509 = vpow2.f32 %v2375_v5  ;;  %v3500_v42 = vpop.eup %3499  ;;  %v2419_v1 = vsel %vm2409_vm7, %v3498_v48, %v4675_v36 }
 0x3cc   : > { %v2867_v3 = vpack.c.bf16 %v2419_v1, %v2418_v12  ;;  %v2389_v4 = vadd.f32 1.0, %v3500_v42 }
 0x3cd   : > { %v3502_v32 = vpop.eup %3501 }
 0x3ce   : > { %2887 = vst [vmem:[%s4082_s7 + $0x20] sm:$0xff] %v2867_v3   ;;  %3511 = vrcp.f32 %v2389_v4  ;;  %v2390_v50 = vadd.f32 1.0, %v3502_v32 }
 0x3cf   : > { %v3504_v41 = vpop.eup %3503 }
 0x3d0   : > { %3513 = vrcp.f32 %v2390_v50  ;;  %v2420_v21 = vsel %vm2409_vm7, %v3504_v41, %v4685_v40 }
 0x3d2   : > { %v3506_v7 = vpop.eup %3505 }
 0x3d3   : > { %v3508_v47 = vpop.eup %3507  ;;  %v2421_v36 = vsel %vm2409_vm7, %v3506_v7, %v4689_v34 }
 0x3d4   : > { %v2872_v49 = vpack.c.bf16 %v2421_v36, %v2420_v21  ;;  %v2391_v8 = vadd.f32 1.0, %v3508_v47 }
 0x3d5   : > { %v3510_v9 = vpop.eup %3509 }
 0x3d6   : > { %2888 = vst [vmem:[%s4082_s7 + $0x28] sm:$0xff] %v2872_v49   ;;  %3515 = vrcp.f32 %v2391_v8  ;;  %v2392_v11 = vadd.f32 1.0, %v3510_v9 }
 0x3d8   : > { %3517 = vrcp.f32 %v2392_v11  ;;  %v3512_v14 = vpop.eup %3511 }
 0x3d9   : > { %v2422_v40 = vsel %vm2409_vm7, %v3512_v14, %v4700_v45 }
 0x3da   : > { %v3514_v16 = vpop.eup %3513 }
 0x3db   : > { %v2423_v34 = vsel %vm2409_vm7, %v3514_v16, %v4705_v55 }
 0x3dc   : > { %v2877_v20 = vpack.c.bf16 %v2423_v34, %v2422_v40 }
 0x3de   : > { %2889 = vst [vmem:[%s4082_s7 + $0x30] sm:$0xff] %v2877_v20  }
 0x3e0   : > { %v3516_v22 = vpop.eup %3515 }
 0x3e1   : > { %v2424_v52 = vsel %vm2409_vm7, %v3516_v22, %v2321_v43 }
 0x3e2   : > { %v3518_v25 = vpop.eup %3517 }
 0x3e3   : > { %v2425_v26 = vsel %vm2409_vm7, %v3518_v25, %v2324_v53 }
 0x3e4   : > { %v2882_v45 = vpack.c.bf16 %v2425_v26, %v2424_v52 }
 0x3e6   : > { %2890 = vst [vmem:[%s4082_s7 + $0x38] sm:$0xff] %v2882_v45  }
 0x3e7   : > { %3675 = shalt.err (!%p3672_p13)
}
 0x3e8   : > { %s3676_s7 = scalar_lea.hbm %s4748_s8, 1024  ;;  %s3680_s6 = scalar_lea.hbm %s4850_s9, 4096 }
 0x3e9   : > { %p3677_p3 = scmp.ne.s32.totalorder %s4748_s8, %s3676_s7  ;;  %p3681_p12 = scmp.lt.u32.totalorder %s4748_s8, %s4850_s9 }
 0x3ea   : > { %p3682_p1 = scmp.lt.u32.totalorder %s3680_s6, %s3676_s7  ;;  %p3684_p6 = scmp.lt.u32.totalorder %s3676_s7, %s4748_s8 }
 0x3eb   : > { %p3678_p8 = pnand %p3677_p3, %p4851_p7 }
 0x3ec   : > { %p3683_p11 = por %p3682_p1, %p3681_p12 }
 0x3ed   : > { %p3679_p2 = pneg %p3678_p8 }
 0x3ee   : > { %p3685_p5 = por %p3684_p6, %p3683_p11 }
 0x3f0   : > { %p3686_p9 = pnand %p3685_p5, %p3679_p2 }
 0x3f2   : > { %3689 = shalt.err (!%p3686_p9)
}
 0x3f3   : > { %s3791_s17 = smov 64   ;;  %s3792_s11 = smov 4  }
 0x3f4   : > { %3163 = dma.vmem_to_hbm [thread:$0]  (%p4851_p7), %s4750_s20, 1024, %s4748_s8, %s2507_s5, %s3791_s17, %s3791_s17, %s3792_s11  }
 0x3f5 PF: > { %s4852_s29 = sld [smem:[#allocation22_spill]]  ;;  %s4853_s24 = sld [smem:[#allocation23_spill]] }
 0x3f6   : > { %p3187_p0 = scmp.ge.s32.totalorder %s3772_s28, 2 }
 0x3fb   : > { %s2538_s25 = sand.u32 1, %s4852_s29   ;;  %p4854_p10 = scmp.ne.s32.totalorder %s4853_s24, 0 }
 0x3fc   : > { %s2539_s30 = scalar_lea.sflag [#allocation6], %s2538_s25 }
 0x3fd   : > { %p3177_p4 = pnand %p3187_p0, %p4854_p10 }
 0x3ff   : > { %3739 = dma.done.wait (!%p3177_p4), %s2539_s30, 1024  }
 0x400   : > { %3741 = vsyncadd (!%p3177_p4), %s2539_s30, 4294966272  ;;  %s23_s28 = sadd.s32 1, %s3772_s28   ;;  %s4855_s12 = sld [smem:[#allocation24_spill]] }
 0x401   : > { %p20_p13 = scmp.ge.s32.totalorder %s23_s28, 6   ;;  %s4856_s21 = smov %s3748_s22 }
 0x402   : > { %s4857_s22 = smov %s3752_s23  ;;  %s4858_s23 = smov %s3983_s2 }
 0x403   : > { %s4859_s24 = smov %s3764_s26  ;;  %s4860_s25 = smov %s3768_s27 }
 0x404   : > { %s4862_s27 = smov %s4868_s19  ;;  %22 = sbr.rel (!%p20_p13) target bundleno = 13 (0xd), region = 126 }
 0x406   : > { %s4861_s26 = smov %s4855_s12 }
 0x40b   :  { %2544 = vsyncpa [#allocation5], 1 }
 0x40c   :  { %2546 = vsyncpa [#allocation5 + $0x1], 1 }
 0x40d   :  { %2547 = vsyncpa [#allocation8], 1 }
 0x40e   :  { %2548 = vsyncpa [#allocation6], 1 }
 0x40f   :  { %2550 = vsyncpa [#allocation6 + $0x1], 1 }
 0x410   :  { %2551 = vsyncmov [#allocation3] }
 0x413   :  { %s2552_s18 = vpop.sfrf %2551 }
 0x414   :  { %p2824_p7 = scmp.ne.s32.totalorder %s2552_s18, 0 }
 0x416   :  { %2556 = shalt.err (%p2824_p7)  }
 0x417   :  { %2558 = vsyncmov [#allocation3 + $0x1] }
 0x41a   :  { %s2559_s2 = vpop.sfrf %2558 }
 0x41b   :  { %p2825_p3 = scmp.ne.s32.totalorder %s2559_s2, 0 }
 0x41d   :  { %2563 = shalt.err (%p2825_p3)  }

</bundles_post_ra>
